<compile_context>
chip_gen: v5e
topology: v5e:2x2
jax: 0.10.0
libtpu: 0.0.40
codegen_flags: <defaults>
</compile_context>

<pallas_src>
import jax
import jax.numpy as jnp
from jax.experimental import pallas as pl
from jax.experimental.pallas import tpu as pltpu

_LANES = 128
_SUBLANES = 8
_MIN_ROWS_PER_TC = 4096  # only split a single tile across 2 TCs if halves stay big


def _round_up(n, m):
    return ((n + m - 1) // m) * m


def _cdiv(a, b):
    return -(-a // b)


def _alpha_kernel(x_ref, y_ref, w1x_ref, w1y_ref, b1_ref, w2_ref, b2_ref, out_ref):
    # fc1 + ReLU: two MXU matmuls (avoids materializing cat([x, y]))
    h = jnp.dot(x_ref[...], w1x_ref[...], preferred_element_type=jnp.float32)
    h = h + jnp.dot(y_ref[...], w1y_ref[...], preferred_element_type=jnp.float32)
    h = jnp.maximum(h + b1_ref[...], 0.0)                     # (block_b, H) f32

    # alpha head (out_features == 1): VPU multiply + lane reduction
    z = jnp.sum(h * w2_ref[...], axis=-1, keepdims=True)      # (block_b, 1)

    if out_ref.shape[-1] != 1:
        # Lane-dense output layout: (block_b, 1) -> (block_b // 128, 128) so the
        # softplus below runs on dense vregs and the store is unmasked.
        z = z.reshape(out_ref.shape)

    z = z + b2_ref[0, 0]                                       # SMEM scalar bias
    # numerically stable softplus (matches F.softplus)
    out_ref[...] = jnp.maximum(z, 0.0) + jnp.log1p(jnp.exp(-jnp.abs(z)))


def alpha_forward(x, y, w1, b1, w2, b2, *, block_b=8192, dense_out=True,
                  input_dtype=jnp.float32, buffers=2,
                  vmem_limit_bytes=48 * 1024 * 1024):
    """x: (B, num_state), y: (B, num_action); returns (B, 1) float32.

    w1: (num_state + num_action, H), b1: (1, H), w2: (H, 1), b2: (1, 1).
    `input_dtype=jnp.bfloat16` halves x/y/W1 HBM traffic (slight numeric drift).
    """
    B, num_state = x.shape
    num_action = y.shape[1]
    H = w1.shape[1]

    in_dt = jnp.dtype(input_dtype)
    x = x.astype(in_dt)
    y = y.astype(in_dt)
    # Split W1 once so x and y never need to be concatenated.
    w1x = w1[:num_state].astype(in_dt)                         # (num_state, H)
    w1y = w1[num_state:].astype(in_dt)                         # (num_action, H)
    b1_row = b1.reshape(1, H).astype(jnp.float32)              # (1, H)
    w2_row = w2.reshape(1, H).astype(jnp.float32)              # (1, H)
    b2_s = b2.reshape(1, 1).astype(jnp.float32)                # SMEM scalar

    # ---- batch tiling ------------------------------------------------------
    bp = _round_up(max(B, 1), _LANES)                 # logical extent (lane groups)
    block_b = _round_up(max(int(block_b), _LANES), _SUBLANES * _LANES)
    if block_b >= bp:
        block_b = bp                                  # one tile that matches bp exactly
    # Give v7x's two TensorCores something to do when a single big tile would
    # otherwise cover the whole batch (no-op loss on v5e/v6e is ~one step).
    if _cdiv(bp, block_b) == 1 and bp >= 2 * _MIN_ROWS_PER_TC:
        block_b = _round_up(_cdiv(bp, 2), _SUBLANES * _LANES)

    grid = (_cdiv(bp, block_b),)
    block_rows = block_b // _LANES

    def stream_spec(shape, index_map):
        if buffers != 2:
            return pl.BlockSpec(shape, index_map, pipeline_mode=pl.Buffered(buffers))
        return pl.BlockSpec(shape, index_map)

    in_specs = [
        stream_spec((block_b, num_state), lambda i: (i, 0)),    # x tile (pipelined)
        stream_spec((block_b, num_action), lambda i: (i, 0)),   # y tile (pipelined)
        pl.BlockSpec((num_state, H), lambda i: (0, 0)),         # W1x (VMEM resident)
        pl.BlockSpec((num_action, H), lambda i: (0, 0)),        # W1y (VMEM resident)
        pl.BlockSpec((1, H), lambda i: (0, 0)),                 # b1 row (resident)
        pl.BlockSpec((1, H), lambda i: (0, 0)),                 # w2 row (resident)
        pl.BlockSpec(memory_space=pltpu.MemorySpace.SMEM),      # b2 scalar
    ]

    if dense_out:
        out_shape = jax.ShapeDtypeStruct((bp // _LANES, _LANES), jnp.float32)
        out_specs = pl.BlockSpec((block_rows, _LANES), lambda i: (i, 0))
    else:
        out_shape = jax.ShapeDtypeStruct((B, 1), jnp.float32)
        out_specs = pl.BlockSpec((block_b, 1), lambda i: (i, 0))

    out = pl.pallas_call(
        _alpha_kernel,
        out_shape=out_shape,
        grid=grid,
        in_specs=in_specs,
        out_specs=out_specs,
        compiler_params=pltpu.CompilerParams(
            dimension_semantics=("parallel",),        # shards batch tiles over v7x's 2 TCs
            vmem_limit_bytes=int(vmem_limit_bytes),
        ),
    )(x, y, w1x, w1y, b1_row, w2_row, b2_s)

    if dense_out:
        out = out.reshape(-1)[:B].reshape(B, 1)
    return out


def init_params(key, num_state, num_action, num_hidden):
    """Deterministic init mirroring nn.Linear's U(-1/sqrt(fan_in), 1/sqrt(fan_in))."""
    k1, k2, k3, k4 = jax.random.split(key, 4)
    fan1 = num_state + num_action
    lim1 = 1.0 / jnp.sqrt(fan1)
    lim2 = 1.0 / jnp.sqrt(num_hidden)
    w1 = jax.random.uniform(k1, (fan1, num_hidden), jnp.float32, -lim1, lim1)
    b1 = jax.random.uniform(k2, (1, num_hidden), jnp.float32, -lim1, lim1)
    w2 = jax.random.uniform(k3, (num_hidden, 1), jnp.float32, -lim2, lim2)
    b2 = jax.random.uniform(k4, (1, 1), jnp.float32, -lim2, lim2)
    return w1, b1, w2, b2


def _reference(x, y, w1, b1, w2, b2):
    xy = jnp.concatenate([x, y], axis=1)
    h = jnp.maximum(xy @ w1 + b1, 0.0)
    return jax.nn.softplus(h @ w2 + b2)


if __name__ == "__main__":
    # NOTE: at tiny batches a fused XLA matmul chain beats any custom kernel;
    # the Pallas path is built for large-B streaming (default block_b=8192).
    num_state, num_action, num_hidden = 16, 8, 32
    batch = 8
    batch_ragged = 1337  # exercises multi-tile grid + partial boundary blocks

    key = jax.random.PRNGKey(0)
    kx, ky, kx2, ky2, kp = jax.random.split(key, 5)
    x = jax.random.normal(kx, (batch, num_state), jnp.float32)
    y = jax.random.normal(ky, (batch, num_action), jnp.float32)
    x2 = jax.random.normal(kx2, (batch_ragged, num_state), jnp.float32)
    y2 = jax.random.normal(ky2, (batch_ragged, num_action), jnp.float32)
    w1, b1, w2, b2 = init_params(kp, num_state, num_action, num_hidden)

    def run(dense_out):
        a1 = alpha_forward(x, y, w1, b1, w2, b2, dense_out=dense_out)
        a2 = alpha_forward(x2, y2, w1, b1, w2, b2, block_b=1024, dense_out=dense_out)
        return jax.block_until_ready(a1), jax.block_until_ready(a2)

    try:
        alpha, alpha2 = run(dense_out=True)
    except Exception:
        # Fallback: lane-sparse (B, 1) output layout (always lowers); same math.
        alpha, alpha2 = run(dense_out=False)

    ref = _reference(x, y, w1, b1, w2, b2)
    ref2 = _reference(x2, y2, w1, b1, w2, b2)
    assert alpha.shape == (batch, 1)
    assert alpha2.shape == (batch_ragged, 1)
    assert jnp.allclose(alpha, ref, atol=1e-5, rtol=1e-5)
    assert jnp.allclose(alpha2, ref2, atol=1e-5, rtol=1e-5)

    print("KERNEL_OK")
</pallas_src>

<mosaic_0001>
module attributes {stable_mosaic.version = 11 : i64} {
  func.func @_alpha_kernel(%arg0: i32, %arg1: memref<128x16xf32, #tpu.memory_space<vmem>>, %arg2: memref<128x8xf32, #tpu.memory_space<vmem>>, %arg3: memref<16x32xf32, #tpu.memory_space<vmem>>, %arg4: memref<8x32xf32, #tpu.memory_space<vmem>>, %arg5: memref<1x32xf32, #tpu.memory_space<vmem>>, %arg6: memref<1x32xf32, #tpu.memory_space<vmem>>, %arg7: memref<1x1xf32, #tpu.memory_space<smem>>, %arg8: memref<1x128xf32, #tpu.memory_space<vmem>>) attributes {dimension_semantics = [#tpu.dimension_semantics<parallel>], iteration_bounds = array<i64: 1>, scalar_prefetch = 0 : i64, scratch_operands = 0 : i64, tpu.core_type = #tpu.core_type<tc>, window_params = [{transform_indices = @transform_0, window_bounds = array<i64: 128, 16>}, {transform_indices = @transform_1, window_bounds = array<i64: 128, 8>}, {pipeline_mode = #tpu.pipeline_mode<synchronous>, transform_indices = @transform_2, window_bounds = array<i64: 16, 32>}, {pipeline_mode = #tpu.pipeline_mode<synchronous>, transform_indices = @transform_3, window_bounds = array<i64: 8, 32>}, {pipeline_mode = #tpu.pipeline_mode<synchronous>, transform_indices = @transform_4, window_bounds = array<i64: 1, 32>}, {pipeline_mode = #tpu.pipeline_mode<synchronous>, transform_indices = @transform_5, window_bounds = array<i64: 1, 32>}, {transform_indices = @transform_6, window_bounds = array<i64: 1, 1>}, {transform_indices = @transform_7, window_bounds = array<i64: 1, 128>}]} {
    %c0 = arith.constant 0 : index
    %c0_0 = arith.constant 0 : index
    %0 = vector.load %arg1[%c0, %c0_0] : memref<128x16xf32, #tpu.memory_space<vmem>>, vector<128x16xf32>
    %c0_1 = arith.constant 0 : index
    %c0_2 = arith.constant 0 : index
    %1 = vector.load %arg3[%c0_1, %c0_2] : memref<16x32xf32, #tpu.memory_space<vmem>>, vector<16x32xf32>
    %cst = arith.constant dense<0.000000e+00> : vector<128x32xf32>
    %2 = tpu.matmul %0, %1, %cst {dimension_numbers = #tpu.dot_dimension_numbers<[1], [0], [0], [1], [0, 0, 1, 1], [], []>} : vector<128x16xf32>, vector<16x32xf32>, vector<128x32xf32> -> vector<128x32xf32>
    %c0_3 = arith.constant 0 : index
    %c0_4 = arith.constant 0 : index
    %3 = vector.load %arg2[%c0_3, %c0_4] : memref<128x8xf32, #tpu.memory_space<vmem>>, vector<128x8xf32>
    %c0_5 = arith.constant 0 : index
    %c0_6 = arith.constant 0 : index
    %4 = vector.load %arg4[%c0_5, %c0_6] : memref<8x32xf32, #tpu.memory_space<vmem>>, vector<8x32xf32>
    %cst_7 = arith.constant dense<0.000000e+00> : vector<128x32xf32>
    %5 = tpu.matmul %3, %4, %cst_7 {dimension_numbers = #tpu.dot_dimension_numbers<[1], [0], [0], [1], [0, 0, 1, 1], [], []>} : vector<128x8xf32>, vector<8x32xf32>, vector<128x32xf32> -> vector<128x32xf32>
    %6 = arith.addf %2, %5 : vector<128x32xf32>
    %c0_8 = arith.constant 0 : index
    %c0_9 = arith.constant 0 : index
    %7 = vector.load %arg5[%c0_8, %c0_9] : memref<1x32xf32, #tpu.memory_space<vmem>>, vector<1x32xf32>
    %8 = vector.broadcast %7 : vector<1x32xf32> to vector<128x32xf32>
    %9 = arith.addf %6, %8 : vector<128x32xf32>
    %cst_10 = arith.constant 0.000000e+00 : f32
    %10 = vector.broadcast %cst_10 : f32 to vector<128x32xf32>
    %11 = arith.maximumf %9, %10 : vector<128x32xf32>
    %c0_11 = arith.constant 0 : index
    %c0_12 = arith.constant 0 : index
    %12 = vector.load %arg6[%c0_11, %c0_12] : memref<1x32xf32, #tpu.memory_space<vmem>>, vector<1x32xf32>
    %13 = vector.broadcast %12 : vector<1x32xf32> to vector<128x32xf32>
    %14 = arith.mulf %11, %13 : vector<128x32xf32>
    %cst_13 = arith.constant dense<0.000000e+00> : vector<128xf32>
    %15 = vector.multi_reduction <add>, %14, %cst_13 [1] : vector<128x32xf32> to vector<128xf32>
    %16 = vector.shape_cast %15 : vector<128xf32> to vector<128x1xf32>
    %17 = vector.shape_cast %16 : vector<128x1xf32> to vector<1x128xf32>
    %c0_14 = arith.constant 0 : index
    %c0_15 = arith.constant 0 : index
    %18 = memref.load %arg7[%c0_14, %c0_15] : memref<1x1xf32, #tpu.memory_space<smem>>
    %19 = vector.broadcast %18 : f32 to vector<1x128xf32>
    %20 = arith.addf %17, %19 : vector<1x128xf32>
    %cst_16 = arith.constant 0.000000e+00 : f32
    %21 = vector.broadcast %cst_16 : f32 to vector<1x128xf32>
    %22 = arith.maximumf %20, %21 : vector<1x128xf32>
    %23 = math.absf %20 : vector<1x128xf32>
    %cst_17 = arith.constant 0.000000e+00 : f32
    %24 = vector.broadcast %cst_17 : f32 to vector<1x128xf32>
    %25 = arith.subf %24, %23 : vector<1x128xf32>
    %26 = math.exp %25 : vector<1x128xf32>
    %27 = math.log1p %26 : vector<1x128xf32>
    %28 = arith.addf %22, %27 : vector<1x128xf32>
    %c0_18 = arith.constant 0 : index
    %c0_19 = arith.constant 0 : index
    %29 = vector.load %arg8[%c0_18, %c0_19] : memref<1x128xf32, #tpu.memory_space<vmem>>, vector<1x128xf32>
    tpu.vector_store %arg8[%c0_18, %c0_19], %28 {strides = array<i32>} : memref<1x128xf32, #tpu.memory_space<vmem>>, vector<1x128xf32>,
    return
  }
  func.func @transform_0(%arg0: i32) -> (i32, i32) {
    %c0_i32 = arith.constant 0 : i32
    %c0_i32_0 = arith.constant 0 : i32
    return %arg0, %c0_i32 : i32, i32
  }
  func.func @transform_1(%arg0: i32) -> (i32, i32) {
    %c0_i32 = arith.constant 0 : i32
    %c0_i32_0 = arith.constant 0 : i32
    return %arg0, %c0_i32 : i32, i32
  }
  func.func @transform_2(%arg0: i32) -> (i32, i32) {
    %c0_i32 = arith.constant 0 : i32
    %c0_i32_0 = arith.constant 0 : i32
    %c0_i32_1 = arith.constant 0 : i32
    return %c0_i32, %c0_i32_0 : i32, i32
  }
  func.func @transform_3(%arg0: i32) -> (i32, i32) {
    %c0_i32 = arith.constant 0 : i32
    %c0_i32_0 = arith.constant 0 : i32
    %c0_i32_1 = arith.constant 0 : i32
    return %c0_i32, %c0_i32_0 : i32, i32
  }
  func.func @transform_4(%arg0: i32) -> (i32, i32) {
    %c0_i32 = arith.constant 0 : i32
    %c0_i32_0 = arith.constant 0 : i32
    %c0_i32_1 = arith.constant 0 : i32
    return %c0_i32, %c0_i32_0 : i32, i32
  }
  func.func @transform_5(%arg0: i32) -> (i32, i32) {
    %c0_i32 = arith.constant 0 : i32
    %c0_i32_0 = arith.constant 0 : i32
    %c0_i32_1 = arith.constant 0 : i32
    return %c0_i32, %c0_i32_0 : i32, i32
  }
  func.func @transform_6(%arg0: i32) -> (i32, i32) {
    %c0_i32 = arith.constant 0 : i32
    %c0_i32_0 = arith.constant 0 : i32
    %c0_i32_1 = arith.constant 0 : i32
    return %c0_i32, %c0_i32_0 : i32, i32
  }
  func.func @transform_7(%arg0: i32) -> (i32, i32) {
    %c0_i32 = arith.constant 0 : i32
    %c0_i32_0 = arith.constant 0 : i32
    return %arg0, %c0_i32 : i32, i32
  }
}

module attributes {stable_mosaic.version = 11 : i64} {
  func.func @_alpha_kernel(%arg0: i32, %arg1: memref<128x16xf32, #tpu.memory_space<vmem>>, %arg2: memref<128x8xf32, #tpu.memory_space<vmem>>, %arg3: memref<16x32xf32, #tpu.memory_space<vmem>>, %arg4: memref<8x32xf32, #tpu.memory_space<vmem>>, %arg5: memref<1x32xf32, #tpu.memory_space<vmem>>, %arg6: memref<1x32xf32, #tpu.memory_space<vmem>>, %arg7: memref<1x1xf32, #tpu.memory_space<smem>>, %arg8: memref<128x1xf32, #tpu.memory_space<vmem>>) attributes {dimension_semantics = [#tpu.dimension_semantics<parallel>], iteration_bounds = array<i64: 1>, scalar_prefetch = 0 : i64, scratch_operands = 0 : i64, tpu.core_type = #tpu.core_type<tc>, window_params = [{transform_indices = @transform_0, window_bounds = array<i64: 128, 16>}, {transform_indices = @transform_1, window_bounds = array<i64: 128, 8>}, {pipeline_mode = #tpu.pipeline_mode<synchronous>, transform_indices = @transform_2, window_bounds = array<i64: 16, 32>}, {pipeline_mode = #tpu.pipeline_mode<synchronous>, transform_indices = @transform_3, window_bounds = array<i64: 8, 32>}, {pipeline_mode = #tpu.pipeline_mode<synchronous>, transform_indices = @transform_4, window_bounds = array<i64: 1, 32>}, {pipeline_mode = #tpu.pipeline_mode<synchronous>, transform_indices = @transform_5, window_bounds = array<i64: 1, 32>}, {transform_indices = @transform_6, window_bounds = array<i64: 1, 1>}, {transform_indices = @transform_7, window_bounds = array<i64: 128, 1>}]} {
    %c0 = arith.constant 0 : index
    %c0_0 = arith.constant 0 : index
    %0 = vector.load %arg1[%c0, %c0_0] : memref<128x16xf32, #tpu.memory_space<vmem>>, vector<128x16xf32>
    %c0_1 = arith.constant 0 : index
    %c0_2 = arith.constant 0 : index
    %1 = vector.load %arg3[%c0_1, %c0_2] : memref<16x32xf32, #tpu.memory_space<vmem>>, vector<16x32xf32>
    %cst = arith.constant dense<0.000000e+00> : vector<128x32xf32>
    %2 = tpu.matmul %0, %1, %cst {dimension_numbers = #tpu.dot_dimension_numbers<[1], [0], [0], [1], [0, 0, 1, 1], [], []>} : vector<128x16xf32>, vector<16x32xf32>, vector<128x32xf32> -> vector<128x32xf32>
    %c0_3 = arith.constant 0 : index
    %c0_4 = arith.constant 0 : index
    %3 = vector.load %arg2[%c0_3, %c0_4] : memref<128x8xf32, #tpu.memory_space<vmem>>, vector<128x8xf32>
    %c0_5 = arith.constant 0 : index
    %c0_6 = arith.constant 0 : index
    %4 = vector.load %arg4[%c0_5, %c0_6] : memref<8x32xf32, #tpu.memory_space<vmem>>, vector<8x32xf32>
    %cst_7 = arith.constant dense<0.000000e+00> : vector<128x32xf32>
    %5 = tpu.matmul %3, %4, %cst_7 {dimension_numbers = #tpu.dot_dimension_numbers<[1], [0], [0], [1], [0, 0, 1, 1], [], []>} : vector<128x8xf32>, vector<8x32xf32>, vector<128x32xf32> -> vector<128x32xf32>
    %6 = arith.addf %2, %5 : vector<128x32xf32>
    %c0_8 = arith.constant 0 : index
    %c0_9 = arith.constant 0 : index
    %7 = vector.load %arg5[%c0_8, %c0_9] : memref<1x32xf32, #tpu.memory_space<vmem>>, vector<1x32xf32>
    %8 = vector.broadcast %7 : vector<1x32xf32> to vector<128x32xf32>
    %9 = arith.addf %6, %8 : vector<128x32xf32>
    %cst_10 = arith.constant 0.000000e+00 : f32
    %10 = vector.broadcast %cst_10 : f32 to vector<128x32xf32>
    %11 = arith.maximumf %9, %10 : vector<128x32xf32>
    %c0_11 = arith.constant 0 : index
    %c0_12 = arith.constant 0 : index
    %12 = vector.load %arg6[%c0_11, %c0_12] : memref<1x32xf32, #tpu.memory_space<vmem>>, vector<1x32xf32>
    %13 = vector.broadcast %12 : vector<1x32xf32> to vector<128x32xf32>
    %14 = arith.mulf %11, %13 : vector<128x32xf32>
    %cst_13 = arith.constant dense<0.000000e+00> : vector<128xf32>
    %15 = vector.multi_reduction <add>, %14, %cst_13 [1] : vector<128x32xf32> to vector<128xf32>
    %16 = vector.shape_cast %15 : vector<128xf32> to vector<128x1xf32>
    %c0_14 = arith.constant 0 : index
    %c0_15 = arith.constant 0 : index
    %17 = memref.load %arg7[%c0_14, %c0_15] : memref<1x1xf32, #tpu.memory_space<smem>>
    %18 = vector.broadcast %17 : f32 to vector<128x1xf32>
    %19 = arith.addf %16, %18 : vector<128x1xf32>
    %cst_16 = arith.constant 0.000000e+00 : f32
    %20 = vector.broadcast %cst_16 : f32 to vector<128x1xf32>
    %21 = arith.maximumf %19, %20 : vector<128x1xf32>
    %22 = math.absf %19 : vector<128x1xf32>
    %cst_17 = arith.constant 0.000000e+00 : f32
    %23 = vector.broadcast %cst_17 : f32 to vector<128x1xf32>
    %24 = arith.subf %23, %22 : vector<128x1xf32>
    %25 = math.exp %24 : vector<128x1xf32>
    %26 = math.log1p %25 : vector<128x1xf32>
    %27 = arith.addf %21, %26 : vector<128x1xf32>
    %c0_18 = arith.constant 0 : index
    %c0_19 = arith.constant 0 : index
    %28 = vector.load %arg8[%c0_18, %c0_19] : memref<128x1xf32, #tpu.memory_space<vmem>>, vector<128x1xf32>
    tpu.vector_store %arg8[%c0_18, %c0_19], %27 {strides = array<i32>} : memref<128x1xf32, #tpu.memory_space<vmem>>, vector<128x1xf32>,
    return
  }
  func.func @transform_0(%arg0: i32) -> (i32, i32) {
    %c0_i32 = arith.constant 0 : i32
    %c0_i32_0 = arith.constant 0 : i32
    return %arg0, %c0_i32 : i32, i32
  }
  func.func @transform_1(%arg0: i32) -> (i32, i32) {
    %c0_i32 = arith.constant 0 : i32
    %c0_i32_0 = arith.constant 0 : i32
    return %arg0, %c0_i32 : i32, i32
  }
  func.func @transform_2(%arg0: i32) -> (i32, i32) {
    %c0_i32 = arith.constant 0 : i32
    %c0_i32_0 = arith.constant 0 : i32
    %c0_i32_1 = arith.constant 0 : i32
    return %c0_i32, %c0_i32_0 : i32, i32
  }
  func.func @transform_3(%arg0: i32) -> (i32, i32) {
    %c0_i32 = arith.constant 0 : i32
    %c0_i32_0 = arith.constant 0 : i32
    %c0_i32_1 = arith.constant 0 : i32
    return %c0_i32, %c0_i32_0 : i32, i32
  }
  func.func @transform_4(%arg0: i32) -> (i32, i32) {
    %c0_i32 = arith.constant 0 : i32
    %c0_i32_0 = arith.constant 0 : i32
    %c0_i32_1 = arith.constant 0 : i32
    return %c0_i32, %c0_i32_0 : i32, i32
  }
  func.func @transform_5(%arg0: i32) -> (i32, i32) {
    %c0_i32 = arith.constant 0 : i32
    %c0_i32_0 = arith.constant 0 : i32
    %c0_i32_1 = arith.constant 0 : i32
    return %c0_i32, %c0_i32_0 : i32, i32
  }
  func.func @transform_6(%arg0: i32) -> (i32, i32) {
    %c0_i32 = arith.constant 0 : i32
    %c0_i32_0 = arith.constant 0 : i32
    %c0_i32_1 = arith.constant 0 : i32
    return %c0_i32, %c0_i32_0 : i32, i32
  }
  func.func @transform_7(%arg0: i32) -> (i32, i32) {
    %c0_i32 = arith.constant 0 : i32
    %c0_i32_0 = arith.constant 0 : i32
    return %arg0, %c0_i32 : i32, i32
  }
}

</mosaic_0001>

<bundles_post_ra>
// kernel: tpu_custom_call.1
= control target key start
LH: loop header
LB: loop body
LE: loop exit
PB: predicated region body
PF: predicated region fallthrough
CT: control target
= control target key end

     0   :  { %13 = vsyncpa [#allocation4], 0  ;;  %s1533_s0 = inlined_call_operand.hbm [shape: f32[8,16], index: 0, kind: input, shape index: {}]   ;;  %s1534_s1 = inlined_call_operand.hbm [shape: f32[8,8], index: 1, kind: input, shape index: {}]   ;;  %s1535_s2 = inlined_call_operand.hbm [shape: f32[16,32], index: 2, kind: input, shape index: {}]   ;;  %s1536_s3 = inlined_call_operand.hbm [shape: f32[8,32], index: 3, kind: input, shape index: {}]   ;;  %s1537_s4 = inlined_call_operand.vmem [shape: f32[1,32], index: 4, kind: input, shape index: {}]   ;;  %s1538_s5 = inlined_call_operand.vmem [shape: f32[1,32], index: 5, kind: input, shape index: {}]   ;;  %s1539_s6 = inlined_call_operand.<no memory space> [shape: f32[1,1], index: 6, kind: input, shape index: {}]   ;;  %s1540_s7 = inlined_call_operand.hbm [shape: f32[1,128], index: 7, kind: output, shape index: {}]  }
   0x1   :  { %14 = vsyncpa [#allocation7], 0 }
   0x2   :  { %15 = vsyncpa [#allocation10], 0 }
   0x3   :  { %16 = vsyncpa [#allocation5], 0 }
   0x4   :  { %20 = vsyncadd [#allocation4], 1920  ;;  %s21_s26 = sshll.u32 %s1533_s0, 4  ;;  %s1051_s27 = smov [#allocation3]   ;;  %s22_s26 = int_to_ptr.hbm [resolvable:$true] %s21_s26 }
   0x5   :  { %s23_s28 = sshll.u32 %s1051_s27, 4  ;;  %s1052_s29 = smov 128   ;;  %s24_s28 = int_to_ptr.vmem [resolvable:$true] %s23_s28 }
   0x6   :  { %s1053_s30 = smov 8  }
   0x7   :  { %29 = dma.hbm_to_vmem [thread:$0]  %s22_s26, 128, %s24_s28, [#allocation4], %s1052_s29, %s1052_s29, %s1053_s30  }
   0x8   :  { %33 = vsyncadd [#allocation7], 1920  ;;  %s34_s10 = sshll.u32 %s1534_s1, 4  ;;  %s1054_s11 = smov [#allocation6]   ;;  %s35_s10 = int_to_ptr.hbm [resolvable:$true] %s34_s10 }
   0x9   :  { %s36_s12 = sshll.u32 %s1054_s11, 4  ;;  %s47_s0 = sshll.u32 %s1535_s2, 4  ;;  %s37_s12 = int_to_ptr.vmem [resolvable:$true] %s36_s12  ;;  %s48_s0 = int_to_ptr.hbm [resolvable:$true] %s47_s0 }
   0xa   :  { %42 = dma.hbm_to_vmem [thread:$0]  %s35_s10, 128, %s37_s12, [#allocation7], %s1052_s29, %s1052_s29, %s1053_s30  }
   0xb   :  { %s1055_s15 = smov [#allocation8]   ;;  %s61_s19 = sshll.u32 %s1536_s3, 4  ;;  %s62_s19 = int_to_ptr.hbm [resolvable:$true] %s61_s19 }
   0xc   :  { %s49_s16 = sshll.u32 %s1055_s15, 4  ;;  %s1056_s1 = smov [#allocation9]   ;;  %s50_s16 = int_to_ptr.vmem [resolvable:$true] %s49_s16 }
   0xd   :  { %55 = dma.hbm_to_vmem [thread:$0]  %s48_s0, 256, %s50_s16, [#allocation7], %s1052_s29, %s1052_s29, %s1053_s30  }
   0xe   :  { %s63_s20 = sshll.u32 %s1056_s1, 4  ;;  %s64_s20 = int_to_ptr.vmem [resolvable:$true] %s63_s20 }
   0xf   :  { %66 = dma.hbm_to_vmem [thread:$0]  %s62_s19, 128, %s64_s20, [#allocation10]  }
  0x10   :  { %1043 = dma.done.wait [#allocation4], 2048  }
  0x11   :  { %1044 = vsyncadd [#allocation4], 4294965248 }
  0x12   :  { %1045 = dma.done.wait [#allocation7], 2304  }
  0x13   :  { %1046 = vsyncadd [#allocation7], 4294964992 }
  0x14   :  { %1047 = dma.done.wait [#allocation10], 128  }
  0x15   :  { %1048 = vsyncadd [#allocation10], 4294967168  ;;  %vm124_vm0 = vcmask 64512   ;;  %v123_v0 = vld [vmem:[#allocation9] sm:$0xff]  ;;  %v106_v1 = vld [vmem:[#allocation8 + $0x8] sm:$0xff]  ;;  %vm238_vm1 = vcmask 130048  }
  0x16   :  { %v107_v2 = vld [vmem:[#allocation6] sm:$0xff]  ;;  %188 = vmatpush.msra.mxu0 %v123_v0  ;;  %301 = vmatpush.msra.mxu1 %v106_v1  ;;  %v116_v6 = vld [vmem:[#allocation6 + $0x48] sm:$0xff]  ;;  %v117_v10 = vld [vmem:[#allocation6 + $0x50] sm:$0xff]  ;;  %vm408_vm2 = vcmask 261120   ;;  %vm736_vm5 = vcmask 130112   ;;  %vm740_vm7 = vcmask 195712  }
  0x17   :  { %v105_v3 = vld [vmem:[#allocation8] sm:$0xff]  ;;  %848 = vmatpush.msra.mxu2 %v106_v1  ;;  %815 = vmatmul.msk.f32.vlgmr.msra.gmra.mxu0 %vm124_vm0, %v107_v2  ;;  %v108_v7 = vld [vmem:[#allocation6 + $0x8] sm:$0xff]  ;;  %v109_v11 = vld [vmem:[#allocation6 + $0x10] sm:$0xff]  ;;  %vm744_vm13 = vcmask 261312   ;;  %vm748_vm14 = vcmask 326912   ;;  %s803_s26 = sshll.u32 %s1540_s7, 4  ;;  %s804_s26 = int_to_ptr.hbm [resolvable:$true] %s803_s26 }
  0x18   :  { %v89_v4 = vld [vmem:[#allocation3] sm:$0xff]  ;;  %302 = vmatpush.msra.mxu1 %v105_v3  ;;  %847 = vmatpush.msra.mxu3 %v123_v0  ;;  %v90_v8 = vld [vmem:[#allocation3 + $0x8] sm:$0xff]  ;;  %v91_v12 = vld [vmem:[#allocation3 + $0x10] sm:$0xff] }
  0x19   :  { %v97_v5 = vld [vmem:[#allocation3 + $0x40] sm:$0xff]  ;;  %849 = vmatpush.msra.mxu2 %v105_v3  ;;  %831 = vmatmul.msk.f32.vlgmr.msra.gmra.mxu1 %vm238_vm1, %v89_v4  ;;  %v98_v9 = vld [vmem:[#allocation3 + $0x48] sm:$0xff]  ;;  %v99_v13 = vld [vmem:[#allocation3 + $0x50] sm:$0xff] }
  0x1a   :  { %839 = vmatmul.msk.f32.vlgmr.msra.gmra.mxu2 %vm238_vm1, %v97_v5  ;;  %824 = vmatmul.msk.f32.vlgmr.msra.gmra.mxu3 %vm124_vm0, %v116_v6  ;;  %v118_v14 = vld [vmem:[#allocation6 + $0x58] sm:$0xff]  ;;  %v119_v18 = vld [vmem:[#allocation6 + $0x60] sm:$0xff]  ;;  %v120_v22 = vld [vmem:[#allocation6 + $0x68] sm:$0xff] }
  0x1b   :  { %v110_v15 = vld [vmem:[#allocation6 + $0x18] sm:$0xff]  ;;  %v111_v19 = vld [vmem:[#allocation6 + $0x20] sm:$0xff]  ;;  %v112_v23 = vld [vmem:[#allocation6 + $0x28] sm:$0xff] }
  0x1c   :  { %v92_v16 = vld [vmem:[#allocation3 + $0x18] sm:$0xff]  ;;  %v93_v20 = vld [vmem:[#allocation3 + $0x20] sm:$0xff]  ;;  %v94_v24 = vld [vmem:[#allocation3 + $0x28] sm:$0xff] }
  0x1d   :  { %v100_v17 = vld [vmem:[#allocation3 + $0x58] sm:$0xff]  ;;  %v101_v21 = vld [vmem:[#allocation3 + $0x60] sm:$0xff]  ;;  %v102_v25 = vld [vmem:[#allocation3 + $0x68] sm:$0xff] }
  0x1e   :  { %v121_v26 = vld [vmem:[#allocation6 + $0x70] sm:$0xff]  ;;  %v122_v30 = vld [vmem:[#allocation6 + $0x78] sm:$0xff]  ;;  %v115_v34 = vld [vmem:[#allocation6 + $0x40] sm:$0xff] }
  0x1f   :  { %816 = vmatmul.msk.f32.gmra.mxu0 %vm124_vm0, %v108_v7  ;;  %v113_v27 = vld [vmem:[#allocation6 + $0x30] sm:$0xff]  ;;  %v114_v31 = vld [vmem:[#allocation6 + $0x38] sm:$0xff]  ;;  %v1145_v36 = vld [vmem:[%s1537_s4] ss:$0 sm:$0xff] }
  0x20   :  { %v95_v28 = vld [vmem:[#allocation3 + $0x30] sm:$0xff]  ;;  %v96_v32 = vld [vmem:[#allocation3 + $0x38] sm:$0xff]  ;;  %v1151_v40 = vld [vmem:[%s1538_s5] ss:$0 sm:$0xff] }
  0x21   :  { %832 = vmatmul.msk.f32.gmra.mxu1 %vm238_vm1, %v90_v8  ;;  %v103_v29 = vld [vmem:[#allocation3 + $0x70] sm:$0xff]  ;;  %v104_v33 = vld [vmem:[#allocation3 + $0x78] sm:$0xff] }
  0x22   :  { %840 = vmatmul.msk.f32.gmra.mxu2 %vm238_vm1, %v98_v9  ;;  %825 = vmatmul.msk.f32.gmra.mxu3 %vm124_vm0, %v117_v10 }
  0x27   :  { %817 = vmatmul.msk.f32.gmra.mxu0 %vm124_vm0, %v109_v11 }
  0x29   :  { %833 = vmatmul.msk.f32.gmra.mxu1 %vm238_vm1, %v91_v12 }
  0x2a   :  { %841 = vmatmul.msk.f32.gmra.mxu2 %vm238_vm1, %v99_v13  ;;  %826 = vmatmul.msk.f32.gmra.mxu3 %vm124_vm0, %v118_v14 }
  0x2f   :  { %818 = vmatmul.msk.f32.gmra.mxu0 %vm124_vm0, %v110_v15 }
  0x31   :  { %834 = vmatmul.msk.f32.gmra.mxu1 %vm238_vm1, %v92_v16 }
  0x32   :  { %842 = vmatmul.msk.f32.gmra.mxu2 %vm238_vm1, %v100_v17  ;;  %827 = vmatmul.msk.f32.gmra.mxu3 %vm124_vm0, %v119_v18 }
  0x37   :  { %819 = vmatmul.msk.f32.gmra.mxu0 %vm124_vm0, %v111_v19 }
  0x39   :  { %835 = vmatmul.msk.f32.gmra.mxu1 %vm238_vm1, %v93_v20 }
  0x3a   :  { %843 = vmatmul.msk.f32.gmra.mxu2 %vm238_vm1, %v101_v21  ;;  %828 = vmatmul.msk.f32.gmra.mxu3 %vm124_vm0, %v120_v22 }
  0x3f   :  { %820 = vmatmul.msk.f32.gmra.mxu0 %vm124_vm0, %v112_v23 }
  0x41   :  { %836 = vmatmul.msk.f32.gmra.mxu1 %vm238_vm1, %v94_v24 }
  0x42   :  { %844 = vmatmul.msk.f32.gmra.mxu2 %vm238_vm1, %v102_v25  ;;  %829 = vmatmul.msk.f32.gmra.mxu3 %vm124_vm0, %v121_v26 }
  0x47   :  { %821 = vmatmul.msk.f32.gmra.mxu0 %vm124_vm0, %v113_v27 }
  0x49   :  { %837 = vmatmul.msk.f32.gmra.mxu1 %vm238_vm1, %v95_v28 }
  0x4a   :  { %845 = vmatmul.msk.f32.gmra.mxu2 %vm238_vm1, %v103_v29  ;;  %830 = vmatmul.msk.f32.gmra.mxu3 %vm124_vm0, %v122_v30 }
  0x4f   :  { %822 = vmatmul.msk.f32.gmra.mxu0 %vm124_vm0, %v114_v31 }
  0x51   :  { %838 = vmatmul.msk.f32.gmra.mxu1 %vm238_vm1, %v96_v32 }
  0x52   :  { %846 = vmatmul.msk.f32.gmra.mxu2 %vm238_vm1, %v104_v33 }
  0x57   :  { %823 = vmatmul.msk.f32.gmra.mxu0 %vm124_vm0, %v115_v34  ;;  %vm752_vm0 = vcmask 392512  }
  0x94   :  { %v190_v35 = vpop.f32.mrf.mxu0 }
  0x96   :  { %v304_v37 = vpop.f32.mrf.mxu1 }
  0x97   :  { %v305_v38 = vadd.f32 %v304_v37, %v190_v35 }
  0x99   :  { %v356_v39 = vadd.f32 %v1145_v36, %v305_v38 }
  0x9b   :  { %v372_v41 = vmax.f32 %v356_v39, 0.0 }
  0x9c   :  { %v193_v42 = vpop.f32.mrf.mxu0 }
  0x9d   :  { %v1153_v43 = vpop.f32.mrf.mxu2  ;;  %v392_v44 = vmul.f32 %v1151_v40, %v372_v41  ;;  %v217_v45 = vpop.f32.mrf.mxu3 }
  0x9e   :  { %v307_v46 = vpop.f32.mrf.mxu1 }
  0x9f   :  { %v308_v47 = vadd.f32 %v307_v46, %v193_v42  ;;  %v409_v48 = vsel %vm408_vm2, %v392_v44, 0.0 }
  0xa0   :  { %410 = vadd.xlane.f32.xlu0 %v409_v48 }
  0xa1   :  { %v357_v49 = vadd.f32 %v1145_v36, %v308_v47 }
  0xa3   :  { %v373_v50 = vmax.f32 %v357_v49, 0.0 }
  0xa4   :  { %v196_v51 = vpop.f32.mrf.mxu0 }
  0xa5   :  { %v331_v52 = vpop.f32.mrf.mxu2  ;;  %v393_v53 = vmul.f32 %v1151_v40, %v373_v50  ;;  %v220_v54 = vpop.f32.mrf.mxu3 }
  0xa6   :  { %v332_v55 = vadd.f32 %v331_v52, %v217_v45  ;;  %v310_v56 = vpop.f32.mrf.mxu1 }
  0xa7   :  { %v311_v57 = vadd.f32 %v310_v56, %v196_v51  ;;  %v412_v58 = vsel %vm408_vm2, %v393_v53, 0.0 }
  0xa8   :  { %v365_v59 = vadd.f32 %v1145_v36, %v332_v55  ;;  %413 = vadd.xlane.f32.xlu0 %v412_v58 }
  0xa9   :  { %v358_v60 = vadd.f32 %v1145_v36, %v311_v57 }
  0xaa   :  { %v381_v61 = vmax.f32 %v365_v59, 0.0 }
  0xab   :  { %v374_v62 = vmax.f32 %v358_v60, 0.0 }
  0xac   :  { %v199_v63 = vpop.f32.mrf.mxu0  ;;  %v401_v0 = vmul.f32 %v1151_v40, %v381_v61 }
  0xad   :  { %v334_v1 = vpop.f32.mrf.mxu2  ;;  %v394_v2 = vmul.f32 %v1151_v40, %v374_v62  ;;  %v223_v3 = vpop.f32.mrf.mxu3 }
  0xae   :  { %v335_v4 = vadd.f32 %v334_v1, %v220_v54  ;;  %v313_v5 = vpop.f32.mrf.mxu1  ;;  %v436_v6 = vsel %vm408_vm2, %v401_v0, 0.0 }
  0xaf   :  { %v314_v7 = vadd.f32 %v313_v5, %v199_v63  ;;  %v415_v8 = vsel %vm408_vm2, %v394_v2, 0.0 }
  0xb0   :  { %v366_v9 = vadd.f32 %v1145_v36, %v335_v4  ;;  %416 = vadd.xlane.f32.xlu1 %v415_v8  ;;  %437 = vadd.xlane.f32.xlu0 %v436_v6 }
  0xb1   :  { %v359_v11 = vadd.f32 %v1145_v36, %v314_v7 }
  0xb2   :  { %v382_v10 = vmax.f32 %v366_v9, 0.0 }
  0xb3   :  { %v375_v19 = vmax.f32 %v359_v11, 0.0 }
  0xb4   :  { %v202_v12 = vpop.f32.mrf.mxu0  ;;  %v402_v13 = vmul.f32 %v1151_v40, %v382_v10 }
  0xb5   :  { %v337_v14 = vpop.f32.mrf.mxu2  ;;  %v226_v15 = vpop.f32.mrf.mxu3  ;;  %v395_v24 = vmul.f32 %v1151_v40, %v375_v19 }
  0xb6   :  { %v338_v16 = vadd.f32 %v337_v14, %v223_v3  ;;  %v316_v17 = vpop.f32.mrf.mxu1  ;;  %v439_v18 = vsel %vm408_vm2, %v402_v13, 0.0 }
  0xb7   :  { %v317_v20 = vadd.f32 %v316_v17, %v202_v12  ;;  %v418_v32 = vsel %vm408_vm2, %v395_v24, 0.0 }
  0xb8   :  { %v367_v21 = vadd.f32 %v1145_v36, %v338_v16  ;;  %440 = vadd.xlane.f32.xlu1 %v439_v18 }
  0xb9   :  { %v360_v23 = vadd.f32 %v1145_v36, %v317_v20 }
  0xba   :  { %v383_v22 = vmax.f32 %v367_v21, 0.0 }
  0xbb   :  { %v376_v28 = vmax.f32 %v360_v23, 0.0 }
  0xbc   :  { %v205_v25 = vpop.f32.mrf.mxu0  ;;  %v403_v26 = vmul.f32 %v1151_v40, %v383_v22 }
  0xbd   :  { %v340_v27 = vpop.f32.mrf.mxu2  ;;  %v229_v33 = vpop.f32.mrf.mxu3  ;;  %v396_v35 = vmul.f32 %v1151_v40, %v376_v28 }
  0xbe   :  { %v442_v29 = vsel %vm408_vm2, %v403_v26, 0.0  ;;  %v319_v30 = vpop.f32.mrf.mxu1  ;;  %v341_v45 = vadd.f32 %v340_v27, %v226_v15 }
  0xbf   :  { %443 = vadd.xlane.f32.xlu2 %v442_v29  ;;  %v320_v31 = vadd.f32 %v319_v30, %v205_v25  ;;  %v421_v44 = vsel %vm408_vm2, %v396_v35, 0.0 }
  0xc0   :  { %419 = vadd.xlane.f32.xlu1 %v418_v32  ;;  %v368_v52 = vadd.f32 %v1145_v36, %v341_v45 }
  0xc1   :  { %v361_v34 = vadd.f32 %v1145_v36, %v320_v31 }
  0xc2   :  { %v384_v62 = vmax.f32 %v368_v52, 0.0 }
  0xc3   :  { %v377_v39 = vmax.f32 %v361_v34, 0.0 }
  0xc4   :  { %v208_v37 = vpop.f32.mrf.mxu0  ;;  %v404_v6 = vmul.f32 %v1151_v40, %v384_v62 }
  0xc5   :  { %v343_v38 = vpop.f32.mrf.mxu2  ;;  %v232_v49 = vpop.f32.mrf.mxu3  ;;  %v397_v51 = vmul.f32 %v1151_v40, %v377_v39 }
  0xc6   :  { %v322_v41 = vpop.f32.mrf.mxu1  ;;  %v344_v42 = vadd.f32 %v343_v38, %v229_v33  ;;  %v445_v16 = vsel %vm408_vm2, %v404_v6, 0.0 }
  0xc7   :  { %v323_v46 = vadd.f32 %v322_v41, %v208_v37  ;;  %422 = vadd.xlane.f32.xlu2 %v421_v44  ;;  %v424_v60 = vsel %vm408_vm2, %v397_v51, 0.0 }
  0xc8   :  { %v369_v47 = vadd.f32 %v1145_v36, %v344_v42 }
  0xc9   :  { %v362_v48 = vadd.f32 %v1145_v36, %v323_v46 }
  0xca   :  { %v385_v50 = vmax.f32 %v369_v47, 0.0 }
  0xcb   :  { %v378_v53 = vmax.f32 %v362_v48, 0.0 }
  0xcc   :  { %v211_v54 = vpop.f32.mrf.mxu0  ;;  %v405_v55 = vmul.f32 %v1151_v40, %v385_v50 }
  0xcd   :  { %v346_v56 = vpop.f32.mrf.mxu2  ;;  %v398_v57 = vmul.f32 %v1151_v40, %v378_v53  ;;  %v235_v5 = vpop.f32.mrf.mxu3 }
  0xce   :  { %v325_v58 = vpop.f32.mrf.mxu1  ;;  %v347_v59 = vadd.f32 %v346_v56, %v232_v49  ;;  %v448_v61 = vsel %vm408_vm2, %v405_v55, 0.0  ;;  %v731_v56 = vlaneseq }
  0xcf   :  { %v326_v63 = vadd.f32 %v325_v58, %v211_v54  ;;  %425 = vadd.xlane.f32.xlu2 %v424_v60  ;;  %v427_v0 = vsel %vm408_vm2, %v398_v57, 0.0 }
  0xd0   :  { %v370_v1 = vadd.f32 %v1145_v36, %v347_v59  ;;  %428 = vadd.xlane.f32.xlu0 %v427_v0  ;;  %v1237_v60 = vand.u32 127, %v731_v56 }
  0xd1   :  { %v363_v2 = vadd.f32 %v1145_v36, %v326_v63 }
  0xd2   :  { %v386_v3 = vmax.f32 %v370_v1, 0.0 }
  0xd3   :  { %v379_v4 = vmax.f32 %v363_v2, 0.0 }
  0xd4   :  { %v214_v7 = vpop.f32.mrf.mxu0  ;;  %v406_v8 = vmul.f32 %v1151_v40, %v386_v3 }
  0xd5   :  { %v329_v9 = vadd.f32 %v1153_v43, %v214_v7  ;;  %v349_v10 = vpop.f32.mrf.mxu2  ;;  %v399_v11 = vmul.f32 %v1151_v40, %v379_v4  ;;  %v1247_v4 = vadd.s32 4294967288, %v1237_v60  ;;  %v1253_v7 = vadd.s32 4294967280, %v1237_v60 }
  0xd6   :  { %v350_v12 = vadd.f32 %v349_v10, %v235_v5  ;;  %v451_v13 = vsel %vm408_vm2, %v406_v8, 0.0 }
  0xd7   :  { %v364_v14 = vadd.f32 %v1145_v36, %v329_v9  ;;  %v430_v15 = vsel %vm408_vm2, %v399_v11, 0.0 }
  0xd8   :  { %v371_v17 = vadd.f32 %v1145_v36, %v350_v12  ;;  %431 = vadd.xlane.f32.xlu1 %v430_v15  ;;  %446 = vadd.xlane.f32.xlu0 %v445_v16  ;;  %v1206_v36 = vstv %s1539_s6  ;;  %s1057_s6 = smov [#allocation11]  }
  0xd9   :  { %v380_v18 = vmax.f32 %v364_v14, 0.0  ;;  %s801_s23 = sshll.u32 %s1057_s6, 4  ;;  %s802_s23 = int_to_ptr.vmem [resolvable:$true] %s801_s23 }
  0xda   :  { %v387_v19 = vmax.f32 %v371_v17, 0.0 }
  0xdb   :  { %v400_v43 = vmul.f32 %v1151_v40, %v380_v18  ;;  %v1263_v18 = vadd.s32 4294967224, %v1237_v60 }
  0xdc   :  { %v407_v20 = vmul.f32 %v1151_v40, %v387_v19 }
  0xdd   :  { %v433_v21 = vsel %vm408_vm2, %v400_v43, 0.0  ;;  %v1267_v43 = vadd.s32 4294967216, %v1237_v60 }
  0xde   :  { %434 = vadd.xlane.f32.xlu2 %v433_v21  ;;  %v454_v22 = vsel %vm408_vm2, %v407_v20, 0.0  ;;  %vm756_vm2 = vcmask 458112  }
  0xe0   :  { %449 = vadd.xlane.f32.xlu1 %v448_v61  ;;  %455 = vadd.xlane.f32.xlu0 %v454_v22 }
  0xe6   :  { %452 = vadd.xlane.f32.xlu2 %v451_v13 }
 0x113   :  { %v411_v23 = vpop.xlane.xlu0 %410 }
 0x114   :  { %v1209_v24 = vadd.f32 %v1206_v36, %v411_v23 }
 0x116   :  { %v491_v40 = vand.u32 2147483647, %v1209_v24  ;;  %v475_v6 = vmax.f32 %v1209_v24, 0.0 }
 0x118   :  { %v507_v28 = vsub.f32 0.0, %v491_v40 }
 0x11a   :  { %v523_v32 = vmul.f32 1.442695, %v507_v28 }
 0x11b   :  { %v414_v25 = vpop.xlane.xlu0 %413 }
 0x11c   :  { %v1213_v26 = vadd.f32 %v1206_v36, %v414_v25  ;;  %859 = vpow2.f32 %v523_v32 }
 0x11e   :  { %v492_v27 = vand.u32 2147483647, %v1213_v26  ;;  %v476_v11 = vmax.f32 %v1213_v26, 0.0 }
 0x120   :  { %v508_v29 = vsub.f32 0.0, %v492_v27 }
 0x122   :  { %v525_v35 = vmul.f32 1.442695, %v508_v29  ;;  %v860_v46 = vpop.eup %859 }
 0x123   :  { %v417_v30 = vpop.xlane.xlu1 %416  ;;  %v438_v31 = vpop.xlane.xlu0 %437  ;;  %v555_v51 = vadd.f32 1.0, %v860_v46  ;;  %v558_v63 = vmul.f32 -0.5, %v860_v46  ;;  %v561_v16 = vand.u32 2147483647, %v860_v46 }
 0x124   :  { %v1217_v33 = vadd.f32 %v1206_v36, %v417_v30  ;;  %v1220_v34 = vadd.f32 %v1206_v36, %v438_v31  ;;  %861 = vpow2.f32 %v525_v35 }
 0x125   :  { %v559_v15 = vadd.f32 1.0, %v558_v63  ;;  %vm1271_vm3 = vcmp.lt.f32.partialorder %v561_v16, 0.0004427343 }
 0x126   :  { %v493_v37 = vand.u32 2147483647, %v1217_v33  ;;  %v500_v39 = vand.u32 2147483647, %v1220_v34  ;;  %v477_v56 = vmax.f32 %v1217_v33, 0.0  ;;  %v484_v63 = vmax.f32 %v1220_v34, 0.0 }
 0x127   :  { %v560_v28 = vmul.f32 %v860_v46, %v559_v15 }
 0x128   :  { %v509_v38 = vsub.f32 0.0, %v493_v37  ;;  %v516_v44 = vsub.f32 0.0, %v500_v39 }
 0x12a   :  { %v527_v41 = vmul.f32 1.442695, %v509_v38  ;;  %v1228_v48 = vpop.eup %861  ;;  %v541_v49 = vmul.f32 1.442695, %v516_v44 }
 0x12b   :  { %v441_v42 = vpop.xlane.xlu1 %440  ;;  %v564_v55 = vadd.f32 1.0, %v1228_v48  ;;  %v567_v0 = vmul.f32 -0.5, %v1228_v48  ;;  %v570_v19 = vand.u32 2147483647, %v1228_v48 }
 0x12c   :  { %v1225_v45 = vadd.f32 %v1206_v36, %v441_v42  ;;  %863 = vpow2.f32 %v527_v41 }
 0x12d   :  { %865 = vpow2.f32 %v541_v49  ;;  %v568_v17 = vadd.f32 1.0, %v567_v0  ;;  %vm1282_vm4 = vcmp.lt.f32.partialorder %v570_v19, 0.0004427343 }
 0x12e   :  { %v501_v47 = vand.u32 2147483647, %v1225_v45  ;;  %867 = vlog2.f32 %v555_v51 }
 0x12f   :  { %v569_v30 = vmul.f32 %v1228_v48, %v568_v17 }
 0x130   :  { %v517_v50 = vsub.f32 0.0, %v501_v47 }
 0x132   :  { %v543_v52 = vmul.f32 1.442695, %v517_v50  ;;  %v444_v53 = vpop.xlane.xlu2 %443  ;;  %v1230_v54 = vpop.eup %863 }
 0x133   :  { %v420_v57 = vpop.xlane.xlu1 %419  ;;  %v573_v58 = vadd.f32 1.0, %v1230_v54  ;;  %v1240_v61 = vadd.f32 %v1206_v36, %v444_v53  ;;  %v1242_v62 = vpop.eup %865  ;;  %v576_v12 = vmul.f32 -0.5, %v1230_v54  ;;  %v579_v31 = vand.u32 2147483647, %v1230_v54 }
 0x134   :  { %869 = vpow2.f32 %v543_v52  ;;  %v1235_v59 = vadd.f32 %v1206_v36, %v420_v57  ;;  %v868_v3 = vpop.eup %867  ;;  %v636_v13 = vadd.f32 1.0, %v1242_v62  ;;  %v639_v44 = vmul.f32 -0.5, %v1242_v62 }
 0x135   :  { %871 = vlog2.f32 %v564_v55  ;;  %v502_v14 = vand.u32 2147483647, %v1240_v61  ;;  %v557_v23 = vmul.f32 0.6931472, %v868_v3  ;;  %v577_v40 = vadd.f32 1.0, %v576_v12 }
 0x136   :  { %873 = vlog2.f32 %v573_v58  ;;  %v494_v1 = vand.u32 2147483647, %v1235_v59  ;;  %vm1293_vm6 = vcmp.lt.f32.partialorder %v579_v31, 0.0004427343  ;;  %v642_v57 = vand.u32 2147483647, %v1242_v62 }
 0x137   :  { %875 = vlog2.f32 %v636_v13  ;;  %v518_v26 = vsub.f32 0.0, %v502_v14  ;;  %v563_v41 = vsel %vm1271_vm3, %v560_v28, %v557_v23  ;;  %v578_v47 = vmul.f32 %v1230_v54, %v577_v40 }
 0x138   :  { %v510_v8 = vsub.f32 0.0, %v494_v1  ;;  %v699_v55 = vadd.f32 %v563_v41, %v475_v6  ;;  %v640_v0 = vadd.f32 1.0, %v639_v44  ;;  %v485_v3 = vmax.f32 %v1225_v45, 0.0 }
 0x139   :  { %v545_v48 = vmul.f32 1.442695, %v518_v26  ;;  %vm1312_vm8 = vcmp.lt.f32.partialorder %v642_v57, 0.0004427343  ;;  %v1317_v45 = vadd.s32 4294967272, %v1237_v60 }
 0x13a   :  { %v423_v2 = vpop.xlane.xlu2 %422  ;;  %v1249_v5 = vpop.eup %869  ;;  %v529_v25 = vmul.f32 1.442695, %v510_v8  ;;  %v1306_v8 = vadd.s32 4294967208, %v1237_v60  ;;  %v733_v14 = vperm.slane %v699_v55, %v1237_v60 }
 0x13b   :  { %v1256_v9 = vadd.f32 %v1206_v36, %v423_v2  ;;  %v872_v10 = vpop.eup %871  ;;  %v645_v20 = vadd.f32 1.0, %v1249_v5  ;;  %v648_v51 = vmul.f32 -0.5, %v1249_v5 }
 0x13c   :  { %v874_v22 = vpop.eup %873  ;;  %v566_v24 = vmul.f32 0.6931472, %v872_v10 }
 0x13d   :  { %v495_v21 = vand.u32 2147483647, %v1256_v9  ;;  %v575_v35 = vmul.f32 0.6931472, %v874_v22  ;;  %877 = vlog2.f32 %v645_v20  ;;  %v876_v53 = vpop.eup %875  ;;  %v649_v13 = vadd.f32 1.0, %v648_v51 }
 0x13e   :  { %879 = vpow2.f32 %v529_v25  ;;  %v572_v46 = vsel %vm1282_vm4, %v569_v30, %v566_v24  ;;  %v638_v12 = vmul.f32 0.6931472, %v876_v53  ;;  %v641_v20 = vmul.f32 %v1242_v62, %v640_v0 }
 0x13f   :  { %v511_v27 = vsub.f32 0.0, %v495_v21  ;;  %v581_v54 = vsel %vm1293_vm6, %v578_v47, %v575_v35  ;;  %v700_v58 = vadd.f32 %v572_v46, %v476_v11  ;;  %v651_v22 = vand.u32 2147483647, %v1249_v5 }
 0x140   :  { %v701_v10 = vadd.f32 %v581_v54, %v477_v56  ;;  %v486_v62 = vmax.f32 %v1240_v61, 0.0  ;;  %v1347_v35 = vadd.s32 4294967264, %v1237_v60  ;;  %v479_v44 = vmax.f32 %v1256_v9, 0.0 }
 0x141   :  { %v531_v37 = vmul.f32 1.442695, %v511_v27  ;;  %v735_v19 = vperm.slane %v700_v58, %v1247_v4  ;;  %v644_v27 = vsel %vm1312_vm8, %v641_v20, %v638_v12  ;;  %v650_v4 = vmul.f32 %v1249_v5, %v649_v13 }
 0x142   :  { %v426_v32 = vpop.xlane.xlu2 %425  ;;  %v739_v26 = vperm.slane %v701_v10, %v1253_v7  ;;  %vm1340_vm9 = vcmp.lt.f32.partialorder %v651_v22, 0.0004427343  ;;  %v478_v5 = vmax.f32 %v1235_v59, 0.0  ;;  %v1352_v42 = vadd.f32 %v644_v27, %v484_v63 }
 0x143   :  { %v1278_v38 = vadd.f32 %v1206_v36, %v426_v32  ;;  %v429_v39 = vpop.xlane.xlu0 %428  ;;  %881 = vpow2.f32 %v531_v37  ;;  %v878_v2 = vpop.eup %877  ;;  %v737_v37 = vsel %vm736_vm5, %v735_v19, %v733_v14  ;;  %v1356_v46 = vadd.s32 4294967256, %v1237_v60 }
 0x144   :  { %v1291_v49 = vadd.f32 %v1206_v36, %v429_v39  ;;  %883 = vpow2.f32 %v545_v48  ;;  %v1309_v6 = vpop.eup %879  ;;  %v647_v21 = vmul.f32 0.6931472, %v878_v2  ;;  %v1362_v51 = vsel %vm740_vm7, %v739_v26, %v737_v37 }
 0x145   :  { %v496_v52 = vand.u32 2147483647, %v1278_v38  ;;  %v582_v24 = vadd.f32 1.0, %v1309_v6  ;;  %v585_v54 = vmul.f32 -0.5, %v1309_v6  ;;  %v767_v2 = vperm.slane %v1352_v42, %v1263_v18 }
 0x146   :  { %v497_v33 = vand.u32 2147483647, %v1291_v49  ;;  %v653_v39 = vsel %vm1340_vm9, %v650_v4, %v647_v21  ;;  %v1380_v10 = vadd.s32 4294967248, %v1237_v60  ;;  %v588_v13 = vand.u32 2147483647, %v1309_v6 }
 0x147   :  { %v512_v1 = vsub.f32 0.0, %v496_v52  ;;  %v1365_v55 = vadd.f32 %v653_v39, %v485_v3  ;;  %v1393_v27 = vadd.s32 4294967240, %v1237_v60  ;;  %vm760_vm4 = vcmask 523712  }
 0x148   :  { %v513_v15 = vsub.f32 0.0, %v497_v33  ;;  %v480_v33 = vmax.f32 %v1278_v38, 0.0  ;;  %vm1405_vm10 = vcmp.lt.f32.partialorder %v588_v13, 0.0004427343  ;;  %vm764_vm5 = vcmask 589312  }
 0x149   :  { %v533_v11 = vmul.f32 1.442695, %v512_v1  ;;  %v1319_v17 = vpop.eup %881  ;;  %vm768_vm6 = vcmask 654912   ;;  %vm772_vm9 = vcmask 720512  }
 0x14a   :  { %v535_v25 = vmul.f32 1.442695, %v513_v15  ;;  %v1333_v28 = vpop.eup %883  ;;  %v591_v29 = vadd.f32 1.0, %v1319_v17  ;;  %v594_v63 = vmul.f32 -0.5, %v1319_v17  ;;  %v771_v15 = vperm.slane %v1365_v55, %v1267_v43 }
 0x14b   :  { %v432_v16 = vpop.xlane.xlu1 %431  ;;  %v447_v23 = vpop.xlane.xlu0 %446  ;;  %885 = vpow2.f32 %v533_v11  ;;  %v657_v7 = vmul.f32 -0.5, %v1333_v28  ;;  %v654_v52 = vadd.f32 1.0, %v1333_v28  ;;  %v660_v3 = vand.u32 2147483647, %v1333_v28 }
 0x14c   :  { %v1326_v40 = vadd.f32 %v1206_v36, %v432_v16  ;;  %887 = vpow2.f32 %v535_v25  ;;  %v1338_v31 = vadd.f32 %v1206_v36, %v447_v23  ;;  %v481_v11 = vmax.f32 %v1291_v49, 0.0 }
 0x14d   :  { %889 = vlog2.f32 %v582_v24  ;;  %v658_v56 = vadd.f32 1.0, %v657_v7  ;;  %v586_v16 = vadd.f32 1.0, %v585_v54  ;;  %v595_v23 = vadd.f32 1.0, %v594_v63 }
 0x14e   :  { %v498_v30 = vand.u32 2147483647, %v1326_v40  ;;  %v503_v47 = vand.u32 2147483647, %v1338_v31  ;;  %891 = vlog2.f32 %v591_v29  ;;  %v597_v24 = vand.u32 2147483647, %v1319_v17 }
 0x14f   :  { %v1388_v22 = vmul.f32 %v1333_v28, %v658_v56  ;;  %v587_v7 = vmul.f32 %v1309_v6, %v586_v16  ;;  %vm1418_vm12 = vcmp.lt.f32.partialorder %v660_v3, 0.0004427343 }
 0x150   :  { %v514_v41 = vsub.f32 0.0, %v498_v30  ;;  %v519_v0 = vsub.f32 0.0, %v503_v47  ;;  %vm1411_vm11 = vcmp.lt.f32.partialorder %v597_v24, 0.0004427343  ;;  %v482_v24 = vmax.f32 %v1326_v40, 0.0 }
 0x151   :  { %v435_v48 = vpop.xlane.xlu2 %434  ;;  %v1359_v50 = vpop.eup %885 }
 0x152   :  { %v537_v53 = vmul.f32 1.442695, %v514_v41  ;;  %v600_v57 = vadd.f32 1.0, %v1359_v50  ;;  %v1369_v58 = vpop.eup %887  ;;  %v1373_v1 = vadd.f32 %v1206_v36, %v435_v48  ;;  %v547_v19 = vmul.f32 1.442695, %v519_v0 }
 0x153   :  { %v890_v12 = vpop.eup %889  ;;  %v609_v14 = vadd.f32 1.0, %v1369_v58  ;;  %v450_v34 = vpop.xlane.xlu1 %449  ;;  %v603_v30 = vmul.f32 -0.5, %v1359_v50  ;;  %v596_v48 = vmul.f32 %v1319_v17, %v595_v23  ;;  %v612_v63 = vmul.f32 -0.5, %v1369_v58 }
 0x154   :  { %893 = vpow2.f32 %v537_v53  ;;  %v456_v20 = vpop.xlane.xlu0 %455  ;;  %v892_v21 = vpop.eup %891  ;;  %v499_v25 = vand.u32 2147483647, %v1373_v1  ;;  %v584_v26 = vmul.f32 0.6931472, %v890_v12  ;;  %v1396_v4 = vadd.f32 %v1206_v36, %v450_v34 }
 0x155   :  { %895 = vlog2.f32 %v654_v52  ;;  %v1402_v32 = vadd.f32 %v1206_v36, %v456_v20  ;;  %v593_v39 = vmul.f32 0.6931472, %v892_v21  ;;  %v1416_v53 = vadd.s32 4294967200, %v1237_v60 }
 0x156   :  { %897 = vlog2.f32 %v600_v57  ;;  %v515_v28 = vsub.f32 0.0, %v499_v25  ;;  %v590_v57 = vsel %vm1405_vm10, %v587_v7, %v584_v26  ;;  %v504_v17 = vand.u32 2147483647, %v1396_v4 }
 0x157   :  { %899 = vpow2.f32 %v547_v19  ;;  %v604_v0 = vadd.f32 1.0, %v603_v30  ;;  %v606_v12 = vand.u32 2147483647, %v1359_v50  ;;  %v506_v13 = vand.u32 2147483647, %v1402_v32 }
 0x158   :  { %901 = vlog2.f32 %v609_v14  ;;  %v539_v56 = vmul.f32 1.442695, %v515_v28  ;;  %v599_v16 = vsel %vm1411_vm11, %v596_v48, %v593_v39  ;;  %v520_v20 = vsub.f32 0.0, %v504_v17 }
 0x159   :  { %v453_v14 = vpop.xlane.xlu2 %452  ;;  %v522_v26 = vsub.f32 0.0, %v506_v13  ;;  %v702_v30 = vadd.f32 %v590_v57, %v478_v5  ;;  %v613_v28 = vadd.f32 1.0, %v612_v63  ;;  %v703_v39 = vadd.f32 %v599_v16, %v479_v44 }
 0x15a   :  { %v1398_v29 = vpop.eup %893  ;;  %v549_v7 = vmul.f32 1.442695, %v520_v20  ;;  %v1440_v37 = vadd.f32 %v1206_v36, %v453_v14  ;;  %vm1445_vm15 = vcmp.lt.f32.partialorder %v606_v12, 0.0004427343  ;;  %v615_v40 = vand.u32 2147483647, %v1369_v58 }
 0x15b   :  { %v618_v41 = vadd.f32 1.0, %v1398_v29  ;;  %v896_v47 = vpop.eup %895  ;;  %v621_v19 = vmul.f32 -0.5, %v1398_v29  ;;  %v553_v52 = vmul.f32 1.442695, %v522_v26  ;;  %v624_v9 = vand.u32 2147483647, %v1398_v29 }
 0x15c   :  { %v898_v54 = vpop.eup %897  ;;  %v1430_v3 = vmul.f32 0.6931472, %v896_v47  ;;  %v505_v44 = vand.u32 2147483647, %v1440_v37  ;;  %v743_v63 = vperm.slane %v702_v30, %v1317_v45  ;;  %vm1456_vm1 = vcmp.lt.f32.partialorder %v615_v40, 0.0004427343 }
 0x15d   :  { %903 = vlog2.f32 %v618_v41  ;;  %v1428_v34 = vpop.eup %899  ;;  %v602_v23 = vmul.f32 0.6931472, %v898_v54  ;;  %v605_v41 = vmul.f32 %v1359_v50, %v604_v0  ;;  %v622_v5 = vadd.f32 1.0, %v621_v19 }
 0x15e   :  { %905 = vpow2.f32 %v539_v56  ;;  %v902_v21 = vpop.eup %901  ;;  %v663_v25 = vadd.f32 1.0, %v1428_v34  ;;  %v614_v50 = vmul.f32 %v1369_v58, %v613_v28  ;;  %v521_v12 = vsub.f32 0.0, %v505_v44 }
 0x15f   :  { %v611_v59 = vmul.f32 0.6931472, %v902_v21  ;;  %907 = vpow2.f32 %v549_v7  ;;  %v608_v36 = vsel %vm1445_vm15, %v605_v41, %v602_v23  ;;  %v623_v58 = vmul.f32 %v1398_v29, %v622_v5 }
 0x160   :  { %909 = vlog2.f32 %v663_v25  ;;  %v704_v13 = vadd.f32 %v608_v36, %v480_v33  ;;  %v662_v45 = vsel %vm1418_vm12, %v1388_v22, %v1430_v3  ;;  %vm1469_vm3 = vcmp.lt.f32.partialorder %v624_v9, 0.0004427343 }
 0x161   :  { %911 = vpow2.f32 %v553_v52  ;;  %v617_v14 = vsel %vm1456_vm1, %v614_v50, %v611_v59  ;;  %v666_v19 = vmul.f32 -0.5, %v1428_v34  ;;  %v551_v38 = vmul.f32 1.442695, %v521_v12 }
 0x162   :  { %v747_v20 = vperm.slane %v703_v39, %v1347_v35  ;;  %v487_v21 = vmax.f32 %v1338_v31, 0.0  ;;  %v762_v23 = vadd.s32 4294967232, %v1237_v60  ;;  %v705_v22 = vadd.f32 %v617_v14, %v481_v11 }
 0x163   :  { %v904_v48 = vpop.eup %903  ;;  %v745_v35 = vsel %vm744_vm13, %v743_v63, %v1362_v51  ;;  %v751_v30 = vperm.slane %v704_v13, %v1356_v46  ;;  %v667_v31 = vadd.f32 1.0, %v666_v19  ;;  %v669_v39 = vand.u32 2147483647, %v1428_v34 }
 0x164   :  { %v906_v56 = vpop.eup %905  ;;  %v620_v54 = vmul.f32 0.6931472, %v904_v48  ;;  %v749_v49 = vsel %vm748_vm14, %v747_v20, %v745_v35  ;;  %v483_v11 = vmax.f32 %v1373_v1, 0.0  ;;  %v755_v48 = vperm.slane %v705_v22, %v1380_v10 }
 0x165   :  { %v627_v57 = vadd.f32 1.0, %v906_v56  ;;  %v630_v0 = vmul.f32 -0.5, %v906_v56  ;;  %v908_v33 = vpop.eup %907  ;;  %v633_v28 = vand.u32 2147483647, %v906_v56  ;;  %v753_v46 = vsel %vm752_vm0, %v751_v30, %v749_v49 }
 0x166   :  { %v626_v29 = vsel %vm1469_vm3, %v623_v58, %v620_v54  ;;  %v910_v6 = vpop.eup %909  ;;  %v672_v25 = vadd.f32 1.0, %v908_v33  ;;  %v675_v47 = vmul.f32 -0.5, %v908_v33  ;;  %v668_v9 = vmul.f32 %v1428_v34, %v667_v31 }
 0x167   :  { %913 = vlog2.f32 %v627_v57  ;;  %v631_v3 = vadd.f32 1.0, %v630_v0  ;;  %v912_v26 = vpop.eup %911  ;;  %v706_v7 = vadd.f32 %v626_v29, %v482_v24  ;;  %v665_v59 = vmul.f32 0.6931472, %v910_v6 }
 0x168   :  { %915 = vpow2.f32 %v551_v38  ;;  %v690_v40 = vadd.f32 1.0, %v912_v26  ;;  %vm634_vm7 = vcmp.lt.f32.partialorder %v633_v28, 0.0004427343  ;;  %v693_v24 = vmul.f32 -0.5, %v912_v26 }
 0x169   :  { %917 = vlog2.f32 %v672_v25  ;;  %v632_v5 = vmul.f32 %v906_v56, %v631_v3  ;;  %v759_v36 = vperm.slane %v706_v7, %v1393_v27  ;;  %vm1491_vm8 = vcmp.lt.f32.partialorder %v669_v39, 0.0004427343 }
 0x16a   :  { %919 = vlog2.f32 %v690_v40  ;;  %v676_v10 = vadd.f32 1.0, %v675_v47  ;;  %v678_v54 = vand.u32 2147483647, %v908_v33  ;;  %v757_v63 = vsel %vm756_vm2, %v755_v48, %v753_v46 }
 0x16b   :  { %v671_v17 = vsel %vm1491_vm8, %v668_v9, %v665_v59  ;;  %v696_v0 = vand.u32 2147483647, %v912_v26  ;;  %v694_v34 = vadd.f32 1.0, %v693_v24  ;;  %v710_v14 = vadd.f32 %v662_v45, %v486_v62 }
 0x16c   :  { %v761_v58 = vsel %vm760_vm4, %v759_v36, %v757_v63  ;;  %vm776_vm10 = vcmask 786112   ;;  %v711_v19 = vadd.f32 %v671_v17, %v487_v21  ;;  %v677_v20 = vmul.f32 %v908_v33, %v676_v10 }
 0x16d   :  { %v914_v41 = vpop.eup %913  ;;  %vm1502_vm11 = vcmp.lt.f32.partialorder %v678_v54, 0.0004427343  ;;  %vm1510_vm12 = vcmp.lt.f32.partialorder %v696_v0, 0.0004427343  ;;  %v695_v6 = vmul.f32 %v912_v26, %v694_v34  ;;  %v775_v3 = vperm.slane %v710_v14, %v1306_v8 }
 0x16e   :  { %v629_v51 = vmul.f32 0.6931472, %v914_v41  ;;  %v916_v52 = vpop.eup %915  ;;  %v488_v18 = vmax.f32 %v1396_v4, 0.0  ;;  %v490_v25 = vmax.f32 %v1402_v32, 0.0  ;;  %vm780_vm13 = vcmask 851712  }
 0x16f   :  { %v681_v57 = vadd.f32 1.0, %v916_v52  ;;  %v918_v56 = vpop.eup %917  ;;  %v684_v12 = vmul.f32 -0.5, %v916_v52  ;;  %v687_v22 = vand.u32 2147483647, %v916_v52  ;;  %v779_v26 = vperm.slane %v711_v19, %v1416_v53 }
 0x170   :  { %v635_v1 = vsel %vm634_vm7, %v632_v5, %v629_v51  ;;  %v674_v13 = vmul.f32 0.6931472, %v918_v56  ;;  %v920_v16 = vpop.eup %919  ;;  %v786_v8 = vadd.s32 4294967184, %v1237_v60  ;;  %v489_v4 = vmax.f32 %v1440_v37, 0.0 }
 0x171   :  { %v707_v50 = vadd.f32 %v635_v1, %v483_v11  ;;  %921 = vlog2.f32 %v681_v57  ;;  %v692_v61 = vmul.f32 0.6931472, %v920_v16  ;;  %v685_v45 = vadd.f32 1.0, %v684_v12 }
 0x172   :  { %v680_v33 = vsel %vm1502_vm11, %v677_v20, %v674_v13  ;;  %vm688_vm14 = vcmp.lt.f32.partialorder %v687_v22, 0.0004427343  ;;  %v790_v28 = vadd.s32 4294967176, %v1237_v60  ;;  %vm784_vm15 = vcmask 917312  }
 0x173   :  { %v763_v27 = vperm.slane %v707_v50, %v762_v23  ;;  %v698_v35 = vsel %vm1510_vm12, %v695_v6, %v692_v61  ;;  %v712_v43 = vadd.f32 %v680_v33, %v488_v18  ;;  %vm788_vm0 = vcmask 982912  }
 0x174   :  { %v714_v7 = vadd.f32 %v698_v35, %v490_v25  ;;  %vm792_vm1 = vcmask 1048512  }
 0x175   :  { %v765_v38 = vsel %vm764_vm5, %v763_v27, %v761_v58 }
 0x176   :  { %v769_v23 = vsel %vm768_vm6, %v767_v2, %v765_v38  ;;  %v782_v2 = vadd.s32 4294967192, %v1237_v60  ;;  %v791_v49 = vperm.slane %v714_v7, %v790_v28 }
 0x177   :  { %v773_v21 = vsel %vm772_vm9, %v771_v15, %v769_v23  ;;  %v922_v42 = vpop.eup %921  ;;  %v686_v15 = vmul.f32 %v916_v52, %v685_v45 }
 0x178   :  { %v683_v55 = vmul.f32 0.6931472, %v922_v42  ;;  %v777_v30 = vsel %vm776_vm10, %v775_v3, %v773_v21  ;;  %v783_v41 = vperm.slane %v712_v43, %v782_v2 }
 0x179   :  { %v781_v39 = vsel %vm780_vm13, %v779_v26, %v777_v30 }
 0x17a   :  { %v689_v32 = vsel %vm688_vm14, %v686_v15, %v683_v55  ;;  %v785_v37 = vsel %vm784_vm15, %v783_v41, %v781_v39 }
 0x17b   :  { %v713_v31 = vadd.f32 %v689_v32, %v489_v4 }
 0x17d   :  { %v787_v53 = vperm.slane %v713_v31, %v786_v8 }
 0x17f   :  { %v789_v11 = vsel %vm788_vm0, %v787_v53, %v785_v37 }
 0x180   :  { %v793_v60 = vsel %vm792_vm1, %v791_v49, %v789_v11 }
 0x181   :  { %795 = vst [vmem:[#allocation11] sm:$0x1] %v793_v60 }
 0x182   :  { %806 = dma.vmem_to_hbm [thread:$0]  %s802_s23, 16, %s804_s26, [#allocation5]  }
 0x183   :  { %1049 = dma.done.wait [#allocation5], 16  }
 0x184   :  { %1050 = vsyncadd [#allocation5], 4294967280 }
 0x185   :  { %811 = vsyncpa [#allocation4], 1 }
 0x186   :  { %812 = vsyncpa [#allocation7], 1 }
 0x187   :  { %813 = vsyncpa [#allocation10], 1 }
 0x188   :  { %814 = vsyncpa [#allocation5], 1 }

// kernel: tpu_custom_call.1
= control target key start
LH: loop header
LB: loop body
LE: loop exit
PB: predicated region body
PF: predicated region fallthrough
CT: control target
= control target key end

     0   :  { %13 = vsyncpa [#allocation4], 0  ;;  %s1159_s0 = inlined_call_operand.hbm [shape: f32[8,16], index: 0, kind: input, shape index: {}]   ;;  %s1160_s1 = inlined_call_operand.hbm [shape: f32[8,8], index: 1, kind: input, shape index: {}]   ;;  %s1161_s2 = inlined_call_operand.hbm [shape: f32[16,32], index: 2, kind: input, shape index: {}]   ;;  %s1162_s3 = inlined_call_operand.hbm [shape: f32[8,32], index: 3, kind: input, shape index: {}]   ;;  %s1163_s4 = inlined_call_operand.vmem [shape: f32[1,32], index: 4, kind: input, shape index: {}]   ;;  %s1164_s5 = inlined_call_operand.vmem [shape: f32[1,32], index: 5, kind: input, shape index: {}]   ;;  %s1165_s6 = inlined_call_operand.<no memory space> [shape: f32[1,1], index: 6, kind: input, shape index: {}]   ;;  %s1166_s7 = inlined_call_operand.vmem [shape: f32[8,1], index: 7, kind: output, shape index: {}]  }
   0x1   :  { %14 = vsyncpa [#allocation6], 0 }
   0x2   :  { %15 = vsyncpa [#allocation9], 0 }
   0x3   :  { %19 = vsyncadd [#allocation4], 1920  ;;  %s20_s26 = sshll.u32 %s1159_s0, 4  ;;  %s984_s27 = smov [#allocation3]   ;;  %s21_s26 = int_to_ptr.hbm [resolvable:$true] %s20_s26 }
   0x4   :  { %s22_s28 = sshll.u32 %s984_s27, 4  ;;  %s985_s29 = smov 128   ;;  %s23_s28 = int_to_ptr.vmem [resolvable:$true] %s22_s28 }
   0x5   :  { %s986_s30 = smov 8  }
   0x6   :  { %28 = dma.hbm_to_vmem [thread:$0]  %s21_s26, 128, %s23_s28, [#allocation4], %s985_s29, %s985_s29, %s986_s30  }
   0x7   :  { %32 = vsyncadd [#allocation6], 1920  ;;  %s33_s10 = sshll.u32 %s1160_s1, 4  ;;  %s987_s11 = smov [#allocation5]   ;;  %s34_s10 = int_to_ptr.hbm [resolvable:$true] %s33_s10 }
   0x8   :  { %s35_s12 = sshll.u32 %s987_s11, 4  ;;  %s46_s0 = sshll.u32 %s1161_s2, 4  ;;  %s36_s12 = int_to_ptr.vmem [resolvable:$true] %s35_s12  ;;  %s47_s0 = int_to_ptr.hbm [resolvable:$true] %s46_s0 }
   0x9   :  { %41 = dma.hbm_to_vmem [thread:$0]  %s34_s10, 128, %s36_s12, [#allocation6], %s985_s29, %s985_s29, %s986_s30  }
   0xa   :  { %s988_s15 = smov [#allocation7]   ;;  %s60_s19 = sshll.u32 %s1162_s3, 4  ;;  %s61_s19 = int_to_ptr.hbm [resolvable:$true] %s60_s19 }
   0xb   :  { %s48_s16 = sshll.u32 %s988_s15, 4  ;;  %s989_s1 = smov [#allocation8]   ;;  %s49_s16 = int_to_ptr.vmem [resolvable:$true] %s48_s16 }
   0xc   :  { %54 = dma.hbm_to_vmem [thread:$0]  %s47_s0, 256, %s49_s16, [#allocation6], %s985_s29, %s985_s29, %s986_s30  }
   0xd   :  { %s62_s20 = sshll.u32 %s989_s1, 4  ;;  %s63_s20 = int_to_ptr.vmem [resolvable:$true] %s62_s20 }
   0xe   :  { %65 = dma.hbm_to_vmem [thread:$0]  %s61_s19, 128, %s63_s20, [#allocation9]  }
   0xf   :  { %978 = dma.done.wait [#allocation4], 2048  }
  0x10   :  { %979 = vsyncadd [#allocation4], 4294965248 }
  0x11   :  { %980 = dma.done.wait [#allocation6], 2304  }
  0x12   :  { %981 = vsyncadd [#allocation6], 4294964992 }
  0x13   :  { %982 = dma.done.wait [#allocation9], 128  }
  0x14   :  { %983 = vsyncadd [#allocation9], 4294967168  ;;  %vm123_vm0 = vcmask 64512   ;;  %v122_v0 = vld [vmem:[#allocation8] sm:$0xff]  ;;  %v105_v1 = vld [vmem:[#allocation7 + $0x8] sm:$0xff]  ;;  %vm237_vm1 = vcmask 130048  }
  0x15   :  { %v106_v2 = vld [vmem:[#allocation5] sm:$0xff]  ;;  %187 = vmatpush.msra.mxu0 %v122_v0  ;;  %300 = vmatpush.msra.mxu1 %v105_v1  ;;  %v115_v6 = vld [vmem:[#allocation5 + $0x48] sm:$0xff]  ;;  %v116_v10 = vld [vmem:[#allocation5 + $0x50] sm:$0xff]  ;;  %vm407_vm2 = vcmask 261120   ;;  %vm714_vm4 = vcmask 7168  }
  0x16   :  { %v104_v3 = vld [vmem:[#allocation7] sm:$0xff]  ;;  %808 = vmatpush.msra.mxu2 %v105_v1  ;;  %775 = vmatmul.msk.f32.vlgmr.msra.gmra.mxu0 %vm123_vm0, %v106_v2  ;;  %v107_v7 = vld [vmem:[#allocation5 + $0x8] sm:$0xff]  ;;  %v108_v11 = vld [vmem:[#allocation5 + $0x10] sm:$0xff] }
  0x17   :  { %v88_v4 = vld [vmem:[#allocation3] sm:$0xff]  ;;  %301 = vmatpush.msra.mxu1 %v104_v3  ;;  %807 = vmatpush.msra.mxu3 %v122_v0  ;;  %v89_v8 = vld [vmem:[#allocation3 + $0x8] sm:$0xff]  ;;  %v90_v12 = vld [vmem:[#allocation3 + $0x10] sm:$0xff] }
  0x18   :  { %v96_v5 = vld [vmem:[#allocation3 + $0x40] sm:$0xff]  ;;  %809 = vmatpush.msra.mxu2 %v104_v3  ;;  %791 = vmatmul.msk.f32.vlgmr.msra.gmra.mxu1 %vm237_vm1, %v88_v4  ;;  %v97_v9 = vld [vmem:[#allocation3 + $0x48] sm:$0xff]  ;;  %v98_v13 = vld [vmem:[#allocation3 + $0x50] sm:$0xff] }
  0x19   :  { %799 = vmatmul.msk.f32.vlgmr.msra.gmra.mxu2 %vm237_vm1, %v96_v5  ;;  %784 = vmatmul.msk.f32.vlgmr.msra.gmra.mxu3 %vm123_vm0, %v115_v6  ;;  %v117_v14 = vld [vmem:[#allocation5 + $0x58] sm:$0xff]  ;;  %v118_v18 = vld [vmem:[#allocation5 + $0x60] sm:$0xff]  ;;  %v119_v22 = vld [vmem:[#allocation5 + $0x68] sm:$0xff] }
  0x1a   :  { %v109_v15 = vld [vmem:[#allocation5 + $0x18] sm:$0xff]  ;;  %v110_v19 = vld [vmem:[#allocation5 + $0x20] sm:$0xff]  ;;  %v111_v23 = vld [vmem:[#allocation5 + $0x28] sm:$0xff] }
  0x1b   :  { %v91_v16 = vld [vmem:[#allocation3 + $0x18] sm:$0xff]  ;;  %v92_v20 = vld [vmem:[#allocation3 + $0x20] sm:$0xff]  ;;  %v93_v24 = vld [vmem:[#allocation3 + $0x28] sm:$0xff] }
  0x1c   :  { %v99_v17 = vld [vmem:[#allocation3 + $0x58] sm:$0xff]  ;;  %v100_v21 = vld [vmem:[#allocation3 + $0x60] sm:$0xff]  ;;  %v101_v25 = vld [vmem:[#allocation3 + $0x68] sm:$0xff] }
  0x1d   :  { %v120_v26 = vld [vmem:[#allocation5 + $0x70] sm:$0xff]  ;;  %v121_v30 = vld [vmem:[#allocation5 + $0x78] sm:$0xff]  ;;  %v114_v34 = vld [vmem:[#allocation5 + $0x40] sm:$0xff] }
  0x1e   :  { %776 = vmatmul.msk.f32.gmra.mxu0 %vm123_vm0, %v107_v7  ;;  %v112_v27 = vld [vmem:[#allocation5 + $0x30] sm:$0xff]  ;;  %v113_v31 = vld [vmem:[#allocation5 + $0x38] sm:$0xff]  ;;  %v1077_v36 = vld [vmem:[%s1163_s4] ss:$0 sm:$0xff] }
  0x1f   :  { %v94_v28 = vld [vmem:[#allocation3 + $0x30] sm:$0xff]  ;;  %v95_v32 = vld [vmem:[#allocation3 + $0x38] sm:$0xff]  ;;  %v1083_v40 = vld [vmem:[%s1164_s5] ss:$0 sm:$0xff] }
  0x20   :  { %792 = vmatmul.msk.f32.gmra.mxu1 %vm237_vm1, %v89_v8  ;;  %v102_v29 = vld [vmem:[#allocation3 + $0x70] sm:$0xff]  ;;  %v103_v33 = vld [vmem:[#allocation3 + $0x78] sm:$0xff] }
  0x21   :  { %800 = vmatmul.msk.f32.gmra.mxu2 %vm237_vm1, %v97_v9  ;;  %785 = vmatmul.msk.f32.gmra.mxu3 %vm123_vm0, %v116_v10 }
  0x26   :  { %777 = vmatmul.msk.f32.gmra.mxu0 %vm123_vm0, %v108_v11 }
  0x28   :  { %793 = vmatmul.msk.f32.gmra.mxu1 %vm237_vm1, %v90_v12 }
  0x29   :  { %801 = vmatmul.msk.f32.gmra.mxu2 %vm237_vm1, %v98_v13  ;;  %786 = vmatmul.msk.f32.gmra.mxu3 %vm123_vm0, %v117_v14 }
  0x2e   :  { %778 = vmatmul.msk.f32.gmra.mxu0 %vm123_vm0, %v109_v15 }
  0x30   :  { %794 = vmatmul.msk.f32.gmra.mxu1 %vm237_vm1, %v91_v16 }
  0x31   :  { %802 = vmatmul.msk.f32.gmra.mxu2 %vm237_vm1, %v99_v17  ;;  %787 = vmatmul.msk.f32.gmra.mxu3 %vm123_vm0, %v118_v18 }
  0x36   :  { %779 = vmatmul.msk.f32.gmra.mxu0 %vm123_vm0, %v110_v19 }
  0x38   :  { %795 = vmatmul.msk.f32.gmra.mxu1 %vm237_vm1, %v92_v20 }
  0x39   :  { %803 = vmatmul.msk.f32.gmra.mxu2 %vm237_vm1, %v100_v21  ;;  %788 = vmatmul.msk.f32.gmra.mxu3 %vm123_vm0, %v119_v22 }
  0x3e   :  { %780 = vmatmul.msk.f32.gmra.mxu0 %vm123_vm0, %v111_v23 }
  0x40   :  { %796 = vmatmul.msk.f32.gmra.mxu1 %vm237_vm1, %v93_v24 }
  0x41   :  { %804 = vmatmul.msk.f32.gmra.mxu2 %vm237_vm1, %v101_v25  ;;  %789 = vmatmul.msk.f32.gmra.mxu3 %vm123_vm0, %v120_v26 }
  0x46   :  { %781 = vmatmul.msk.f32.gmra.mxu0 %vm123_vm0, %v112_v27 }
  0x48   :  { %797 = vmatmul.msk.f32.gmra.mxu1 %vm237_vm1, %v94_v28 }
  0x49   :  { %805 = vmatmul.msk.f32.gmra.mxu2 %vm237_vm1, %v102_v29  ;;  %790 = vmatmul.msk.f32.gmra.mxu3 %vm123_vm0, %v121_v30 }
  0x4e   :  { %782 = vmatmul.msk.f32.gmra.mxu0 %vm123_vm0, %v113_v31 }
  0x50   :  { %798 = vmatmul.msk.f32.gmra.mxu1 %vm237_vm1, %v95_v32 }
  0x51   :  { %806 = vmatmul.msk.f32.gmra.mxu2 %vm237_vm1, %v103_v33 }
  0x56   :  { %783 = vmatmul.msk.f32.gmra.mxu0 %vm123_vm0, %v114_v34 }
  0x93   :  { %v189_v35 = vpop.f32.mrf.mxu0 }
  0x95   :  { %v303_v37 = vpop.f32.mrf.mxu1 }
  0x96   :  { %v304_v38 = vadd.f32 %v303_v37, %v189_v35 }
  0x98   :  { %v355_v39 = vadd.f32 %v1077_v36, %v304_v38 }
  0x9a   :  { %v371_v41 = vmax.f32 %v355_v39, 0.0 }
  0x9b   :  { %v192_v42 = vpop.f32.mrf.mxu0 }
  0x9c   :  { %v1085_v43 = vpop.f32.mrf.mxu2  ;;  %v391_v44 = vmul.f32 %v1083_v40, %v371_v41  ;;  %v216_v45 = vpop.f32.mrf.mxu3 }
  0x9d   :  { %v306_v46 = vpop.f32.mrf.mxu1 }
  0x9e   :  { %v307_v47 = vadd.f32 %v306_v46, %v192_v42  ;;  %v408_v48 = vsel %vm407_vm2, %v391_v44, 0.0 }
  0x9f   :  { %409 = vadd.xlane.f32.xlu0 %v408_v48 }
  0xa0   :  { %v356_v49 = vadd.f32 %v1077_v36, %v307_v47 }
  0xa2   :  { %v372_v50 = vmax.f32 %v356_v49, 0.0 }
  0xa3   :  { %v195_v51 = vpop.f32.mrf.mxu0 }
  0xa4   :  { %v330_v52 = vpop.f32.mrf.mxu2  ;;  %v392_v53 = vmul.f32 %v1083_v40, %v372_v50  ;;  %v219_v54 = vpop.f32.mrf.mxu3 }
  0xa5   :  { %v331_v55 = vadd.f32 %v330_v52, %v216_v45  ;;  %v309_v56 = vpop.f32.mrf.mxu1 }
  0xa6   :  { %v310_v57 = vadd.f32 %v309_v56, %v195_v51  ;;  %v411_v58 = vsel %vm407_vm2, %v392_v53, 0.0 }
  0xa7   :  { %v364_v59 = vadd.f32 %v1077_v36, %v331_v55  ;;  %412 = vadd.xlane.f32.xlu0 %v411_v58 }
  0xa8   :  { %v357_v60 = vadd.f32 %v1077_v36, %v310_v57 }
  0xa9   :  { %v380_v61 = vmax.f32 %v364_v59, 0.0 }
  0xaa   :  { %v373_v62 = vmax.f32 %v357_v60, 0.0 }
  0xab   :  { %v198_v63 = vpop.f32.mrf.mxu0  ;;  %v400_v0 = vmul.f32 %v1083_v40, %v380_v61 }
  0xac   :  { %v333_v1 = vpop.f32.mrf.mxu2  ;;  %v393_v2 = vmul.f32 %v1083_v40, %v373_v62  ;;  %v222_v3 = vpop.f32.mrf.mxu3 }
  0xad   :  { %v334_v4 = vadd.f32 %v333_v1, %v219_v54  ;;  %v312_v5 = vpop.f32.mrf.mxu1  ;;  %v435_v6 = vsel %vm407_vm2, %v400_v0, 0.0 }
  0xae   :  { %v313_v7 = vadd.f32 %v312_v5, %v198_v63  ;;  %v414_v8 = vsel %vm407_vm2, %v393_v2, 0.0 }
  0xaf   :  { %v365_v9 = vadd.f32 %v1077_v36, %v334_v4  ;;  %415 = vadd.xlane.f32.xlu1 %v414_v8  ;;  %436 = vadd.xlane.f32.xlu0 %v435_v6 }
  0xb0   :  { %v358_v11 = vadd.f32 %v1077_v36, %v313_v7 }
  0xb1   :  { %v381_v10 = vmax.f32 %v365_v9, 0.0 }
  0xb2   :  { %v374_v19 = vmax.f32 %v358_v11, 0.0 }
  0xb3   :  { %v201_v12 = vpop.f32.mrf.mxu0  ;;  %v401_v13 = vmul.f32 %v1083_v40, %v381_v10 }
  0xb4   :  { %v336_v14 = vpop.f32.mrf.mxu2  ;;  %v225_v15 = vpop.f32.mrf.mxu3  ;;  %v394_v24 = vmul.f32 %v1083_v40, %v374_v19 }
  0xb5   :  { %v337_v16 = vadd.f32 %v336_v14, %v222_v3  ;;  %v315_v17 = vpop.f32.mrf.mxu1  ;;  %v438_v18 = vsel %vm407_vm2, %v401_v13, 0.0 }
  0xb6   :  { %v316_v20 = vadd.f32 %v315_v17, %v201_v12  ;;  %v417_v33 = vsel %vm407_vm2, %v394_v24, 0.0 }
  0xb7   :  { %v366_v21 = vadd.f32 %v1077_v36, %v337_v16  ;;  %439 = vadd.xlane.f32.xlu1 %v438_v18 }
  0xb8   :  { %v359_v23 = vadd.f32 %v1077_v36, %v316_v20 }
  0xb9   :  { %v382_v22 = vmax.f32 %v366_v21, 0.0 }
  0xba   :  { %v375_v28 = vmax.f32 %v359_v23, 0.0  ;;  %v1138_v23 = vstv %s1165_s6 }
  0xbb   :  { %v204_v25 = vpop.f32.mrf.mxu0  ;;  %v402_v26 = vmul.f32 %v1083_v40, %v382_v22 }
  0xbc   :  { %v339_v27 = vpop.f32.mrf.mxu2  ;;  %v228_v34 = vpop.f32.mrf.mxu3  ;;  %v395_v39 = vmul.f32 %v1083_v40, %v375_v28 }
  0xbd   :  { %v340_v29 = vadd.f32 %v339_v27, %v225_v15  ;;  %v441_v30 = vsel %vm407_vm2, %v402_v26, 0.0  ;;  %v318_v31 = vpop.f32.mrf.mxu1 }
  0xbe   :  { %442 = vadd.xlane.f32.xlu2 %v441_v30  ;;  %v319_v32 = vadd.f32 %v318_v31, %v204_v25  ;;  %v420_v48 = vsel %vm407_vm2, %v395_v39, 0.0 }
  0xbf   :  { %v367_v35 = vadd.f32 %v1077_v36, %v340_v29  ;;  %418 = vadd.xlane.f32.xlu1 %v417_v33 }
  0xc0   :  { %v360_v38 = vadd.f32 %v1077_v36, %v319_v32 }
  0xc1   :  { %v383_v37 = vmax.f32 %v367_v35, 0.0 }
  0xc2   :  { %v376_v45 = vmax.f32 %v360_v38, 0.0 }
  0xc3   :  { %v207_v41 = vpop.f32.mrf.mxu0  ;;  %v403_v42 = vmul.f32 %v1083_v40, %v383_v37 }
  0xc4   :  { %v342_v44 = vpop.f32.mrf.mxu2  ;;  %v231_v53 = vpop.f32.mrf.mxu3  ;;  %v396_v55 = vmul.f32 %v1083_v40, %v376_v45 }
  0xc5   :  { %v343_v46 = vadd.f32 %v342_v44, %v228_v34  ;;  %v321_v47 = vpop.f32.mrf.mxu1  ;;  %v444_v49 = vsel %vm407_vm2, %v403_v42, 0.0 }
  0xc6   :  { %v322_v50 = vadd.f32 %v321_v47, %v207_v41  ;;  %421 = vadd.xlane.f32.xlu2 %v420_v48  ;;  %445 = vadd.xlane.f32.xlu0 %v444_v49  ;;  %v423_v63 = vsel %vm407_vm2, %v396_v55, 0.0 }
  0xc7   :  { %v368_v51 = vadd.f32 %v1077_v36, %v343_v46 }
  0xc8   :  { %v361_v52 = vadd.f32 %v1077_v36, %v322_v50 }
  0xc9   :  { %v384_v54 = vmax.f32 %v368_v51, 0.0 }
  0xca   :  { %v377_v56 = vmax.f32 %v361_v52, 0.0 }
  0xcb   :  { %v210_v57 = vpop.f32.mrf.mxu0  ;;  %v404_v58 = vmul.f32 %v1083_v40, %v384_v54 }
  0xcc   :  { %v345_v59 = vpop.f32.mrf.mxu2  ;;  %v397_v60 = vmul.f32 %v1083_v40, %v377_v56  ;;  %v234_v7 = vpop.f32.mrf.mxu3 }
  0xcd   :  { %v346_v61 = vadd.f32 %v345_v59, %v231_v53  ;;  %v324_v62 = vpop.f32.mrf.mxu1  ;;  %v447_v0 = vsel %vm407_vm2, %v404_v58, 0.0 }
  0xce   :  { %v325_v1 = vadd.f32 %v324_v62, %v210_v57  ;;  %424 = vadd.xlane.f32.xlu2 %v423_v63  ;;  %v426_v2 = vsel %vm407_vm2, %v397_v60, 0.0 }
  0xcf   :  { %v369_v3 = vadd.f32 %v1077_v36, %v346_v61  ;;  %427 = vadd.xlane.f32.xlu0 %v426_v2 }
  0xd0   :  { %v362_v4 = vadd.f32 %v1077_v36, %v325_v1 }
  0xd1   :  { %v385_v5 = vmax.f32 %v369_v3, 0.0 }
  0xd2   :  { %v378_v6 = vmax.f32 %v362_v4, 0.0 }
  0xd3   :  { %v213_v8 = vpop.f32.mrf.mxu0  ;;  %v405_v9 = vmul.f32 %v1083_v40, %v385_v5 }
  0xd4   :  { %v328_v10 = vadd.f32 %v1085_v43, %v213_v8  ;;  %v348_v11 = vpop.f32.mrf.mxu2  ;;  %v398_v12 = vmul.f32 %v1083_v40, %v378_v6 }
  0xd5   :  { %v349_v13 = vadd.f32 %v348_v11, %v234_v7  ;;  %v450_v14 = vsel %vm407_vm2, %v405_v9, 0.0 }
  0xd6   :  { %v363_v15 = vadd.f32 %v1077_v36, %v328_v10  ;;  %v429_v16 = vsel %vm407_vm2, %v398_v12, 0.0 }
  0xd7   :  { %v370_v17 = vadd.f32 %v1077_v36, %v349_v13  ;;  %430 = vadd.xlane.f32.xlu1 %v429_v16 }
  0xd8   :  { %v379_v18 = vmax.f32 %v363_v15, 0.0 }
  0xd9   :  { %v386_v19 = vmax.f32 %v370_v17, 0.0 }
  0xda   :  { %v399_v20 = vmul.f32 %v1083_v40, %v379_v18 }
  0xdb   :  { %v406_v21 = vmul.f32 %v1083_v40, %v386_v19 }
  0xdc   :  { %v432_v43 = vsel %vm407_vm2, %v399_v20, 0.0 }
  0xdd   :  { %433 = vadd.xlane.f32.xlu2 %v432_v43  ;;  %v453_v22 = vsel %vm407_vm2, %v406_v21, 0.0 }
  0xde   :  { %454 = vadd.xlane.f32.xlu0 %v453_v22 }
  0xdf   :  { %448 = vadd.xlane.f32.xlu1 %v447_v0 }
  0xe5   :  { %451 = vadd.xlane.f32.xlu2 %v450_v14 }
 0x112   :  { %v410_v36 = vpop.xlane.xlu0 %409 }
 0x113   :  { %v458_v24 = vadd.f32 %v1138_v23, %v410_v36 }
 0x115   :  { %v490_v25 = vand.u32 2147483647, %v458_v24  ;;  %v474_v57 = vmax.f32 %v458_v24, 0.0 }
 0x117   :  { %v506_v26 = vsub.f32 0.0, %v490_v25 }
 0x119   :  { %v522_v27 = vmul.f32 1.442695, %v506_v26 }
 0x11a   :  { %v413_v40 = vpop.xlane.xlu0 %412 }
 0x11b   :  { %818 = vpow2.f32 %v522_v27  ;;  %v459_v28 = vadd.f32 %v1138_v23, %v413_v40 }
 0x11d   :  { %v491_v29 = vand.u32 2147483647, %v459_v28 }
 0x11f   :  { %v507_v30 = vsub.f32 0.0, %v491_v29 }
 0x121   :  { %v819_v31 = vpop.eup %818  ;;  %v524_v32 = vmul.f32 1.442695, %v507_v30 }
 0x122   :  { %v554_v33 = vadd.f32 1.0, %v819_v31  ;;  %v557_v34 = vmul.f32 -0.5, %v819_v31  ;;  %v416_v35 = vpop.xlane.xlu1 %415  ;;  %v437_v37 = vpop.xlane.xlu0 %436  ;;  %v560_v47 = vand.u32 2147483647, %v819_v31 }
 0x123   :  { %820 = vpow2.f32 %v524_v32  ;;  %v460_v38 = vadd.f32 %v1138_v23, %v416_v35  ;;  %v467_v39 = vadd.f32 %v1138_v23, %v437_v37 }
 0x124   :  { %822 = vlog2.f32 %v554_v33  ;;  %v558_v44 = vadd.f32 1.0, %v557_v34  ;;  %vm561_vm3 = vcmp.lt.f32.partialorder %v560_v47, 0.0004427343 }
 0x125   :  { %v492_v41 = vand.u32 2147483647, %v460_v38  ;;  %v499_v42 = vand.u32 2147483647, %v467_v39 }
 0x126   :  { %v559_v52 = vmul.f32 %v819_v31, %v558_v44 }
 0x127   :  { %v508_v45 = vsub.f32 0.0, %v492_v41  ;;  %v515_v46 = vsub.f32 0.0, %v499_v42 }
 0x129   :  { %v821_v48 = vpop.eup %820  ;;  %v526_v49 = vmul.f32 1.442695, %v508_v45  ;;  %v540_v50 = vmul.f32 1.442695, %v515_v46 }
 0x12a   :  { %v823_v51 = vpop.eup %822  ;;  %v563_v53 = vadd.f32 1.0, %v821_v48  ;;  %v440_v54 = vpop.xlane.xlu1 %439 }
 0x12b   :  { %v556_v55 = vmul.f32 0.6931472, %v823_v51  ;;  %824 = vpow2.f32 %v526_v49  ;;  %v468_v56 = vadd.f32 %v1138_v23, %v440_v54 }
 0x12c   :  { %826 = vlog2.f32 %v563_v53 }
 0x12d   :  { %v562_v58 = vsel %vm561_vm3, %v559_v52, %v556_v55  ;;  %828 = vpow2.f32 %v540_v50  ;;  %v500_v59 = vand.u32 2147483647, %v468_v56 }
 0x12e   :  { %v698_v60 = vadd.f32 %v562_v58, %v474_v57 }
 0x12f   :  { %v516_v61 = vsub.f32 0.0, %v500_v59 }
 0x130   :  { %715 = vst.msk [vmem:[#allocation10] sm:$0xff] %vm714_vm4, %v698_v60 }
 0x131   :  { %v825_v62 = vpop.eup %824  ;;  %v542_v63 = vmul.f32 1.442695, %v516_v61  ;;  %v443_v0 = vpop.xlane.xlu2 %442 }
 0x132   :  { %v827_v1 = vpop.eup %826  ;;  %v572_v2 = vadd.f32 1.0, %v825_v62  ;;  %v469_v3 = vadd.f32 %v1138_v23, %v443_v0  ;;  %v419_v4 = vpop.xlane.xlu1 %418 }
 0x133   :  { %v829_v5 = vpop.eup %828  ;;  %830 = vpow2.f32 %v542_v63  ;;  %v461_v7 = vadd.f32 %v1138_v23, %v419_v4 }
 0x134   :  { %832 = vlog2.f32 %v572_v2  ;;  %v635_v6 = vadd.f32 1.0, %v829_v5  ;;  %v501_v8 = vand.u32 2147483647, %v469_v3 }
 0x135   :  { %v493_v11 = vand.u32 2147483647, %v461_v7 }
 0x136   :  { %834 = vlog2.f32 %v635_v6  ;;  %v517_v10 = vsub.f32 0.0, %v501_v8 }
 0x137   :  { %v761_v9 = vld [vmem:[#allocation10] sm:$0xff]  ;;  %v509_v18 = vsub.f32 0.0, %v493_v11 }
 0x138   :  { %762 = vst [vmem:[%s1166_s7] sm:$0xff] %v761_v9  ;;  %v544_v17 = vmul.f32 1.442695, %v517_v10 }
 0x139   :  { %v831_v12 = vpop.eup %830  ;;  %v422_v13 = vpop.xlane.xlu2 %421  ;;  %v528_v43 = vmul.f32 1.442695, %v509_v18 }
 0x13a   :  { %v446_v14 = vpop.xlane.xlu0 %445  ;;  %v833_v15 = vpop.eup %832  ;;  %v644_v16 = vadd.f32 1.0, %v831_v12  ;;  %v462_v19 = vadd.f32 %v1138_v23, %v422_v13 }
 0x13b   :  { %v470_v20 = vadd.f32 %v1138_v23, %v446_v14 }
 0x13c   :  { %v835_v21 = vpop.eup %834  ;;  %836 = vlog2.f32 %v644_v16  ;;  %v494_v22 = vand.u32 2147483647, %v462_v19 }
 0x13d   :  { %838 = vpow2.f32 %v544_v17  ;;  %v502_v36 = vand.u32 2147483647, %v470_v20 }
 0x13e   :  { %840 = vpow2.f32 %v528_v43  ;;  %v510_v24 = vsub.f32 0.0, %v494_v22 }
 0x13f   :  { %v518_v25 = vsub.f32 0.0, %v502_v36 }
 0x140   :  { %v530_v40 = vmul.f32 1.442695, %v510_v24 }
 0x141   :  { %v425_v26 = vpop.xlane.xlu2 %424  ;;  %v546_v31 = vmul.f32 1.442695, %v518_v25 }
 0x142   :  { %v837_v27 = vpop.eup %836  ;;  %v463_v28 = vadd.f32 %v1138_v23, %v425_v26  ;;  %v428_v29 = vpop.xlane.xlu0 %427  ;;  %842 = vpow2.f32 %v530_v40 }
 0x143   :  { %v839_v30 = vpop.eup %838  ;;  %v464_v33 = vadd.f32 %v1138_v23, %v428_v29  ;;  %844 = vpow2.f32 %v546_v31 }
 0x144   :  { %v653_v32 = vadd.f32 1.0, %v839_v30  ;;  %v841_v34 = vpop.eup %840  ;;  %v495_v35 = vand.u32 2147483647, %v463_v28 }
 0x145   :  { %v581_v37 = vadd.f32 1.0, %v841_v34  ;;  %v496_v39 = vand.u32 2147483647, %v464_v33 }
 0x146   :  { %846 = vlog2.f32 %v653_v32  ;;  %v511_v38 = vsub.f32 0.0, %v495_v35 }
 0x147   :  { %848 = vlog2.f32 %v581_v37  ;;  %v512_v44 = vsub.f32 0.0, %v496_v39 }
 0x148   :  { %v532_v41 = vmul.f32 1.442695, %v511_v38  ;;  %v843_v42 = vpop.eup %842 }
 0x149   :  { %v845_v45 = vpop.eup %844  ;;  %v590_v46 = vadd.f32 1.0, %v843_v42  ;;  %v534_v50 = vmul.f32 1.442695, %v512_v44 }
 0x14a   :  { %v662_v48 = vadd.f32 1.0, %v845_v45  ;;  %850 = vpow2.f32 %v532_v41  ;;  %v431_v49 = vpop.xlane.xlu1 %430 }
 0x14b   :  { %852 = vlog2.f32 %v590_v46  ;;  %v465_v52 = vadd.f32 %v1138_v23, %v431_v49 }
 0x14c   :  { %v847_v47 = vpop.eup %846  ;;  %854 = vlog2.f32 %v662_v48 }
 0x14d   :  { %v849_v51 = vpop.eup %848  ;;  %856 = vpow2.f32 %v534_v50  ;;  %v497_v54 = vand.u32 2147483647, %v465_v52 }
 0x14f   :  { %v513_v61 = vsub.f32 0.0, %v497_v54 }
 0x150   :  { %v434_v53 = vpop.xlane.xlu2 %433  ;;  %v851_v56 = vpop.eup %850 }
 0x151   :  { %v466_v55 = vadd.f32 %v1138_v23, %v434_v53  ;;  %v455_v57 = vpop.xlane.xlu0 %454  ;;  %v853_v58 = vpop.eup %852  ;;  %v599_v59 = vadd.f32 1.0, %v851_v56  ;;  %v536_v1 = vmul.f32 1.442695, %v513_v61 }
 0x152   :  { %v855_v60 = vpop.eup %854  ;;  %v473_v63 = vadd.f32 %v1138_v23, %v455_v57  ;;  %v449_v3 = vpop.xlane.xlu1 %448 }
 0x153   :  { %v498_v62 = vand.u32 2147483647, %v466_v55  ;;  %858 = vlog2.f32 %v599_v59  ;;  %v857_v0 = vpop.eup %856  ;;  %v471_v8 = vadd.f32 %v1138_v23, %v449_v3 }
 0x154   :  { %v608_v4 = vadd.f32 1.0, %v857_v0  ;;  %860 = vpow2.f32 %v536_v1  ;;  %v505_v7 = vand.u32 2147483647, %v473_v63 }
 0x155   :  { %v514_v2 = vsub.f32 0.0, %v498_v62  ;;  %v503_v12 = vand.u32 2147483647, %v471_v8 }
 0x156   :  { %862 = vlog2.f32 %v608_v4  ;;  %v521_v11 = vsub.f32 0.0, %v505_v7 }
 0x157   :  { %v538_v6 = vmul.f32 1.442695, %v514_v2  ;;  %v519_v15 = vsub.f32 0.0, %v503_v12 }
 0x158   :  { %v452_v5 = vpop.xlane.xlu2 %451  ;;  %v552_v14 = vmul.f32 1.442695, %v521_v11 }
 0x159   :  { %v472_v9 = vadd.f32 %v1138_v23, %v452_v5  ;;  %v859_v10 = vpop.eup %858  ;;  %864 = vpow2.f32 %v538_v6  ;;  %v548_v20 = vmul.f32 1.442695, %v519_v15 }
 0x15a   :  { %v861_v16 = vpop.eup %860  ;;  %866 = vpow2.f32 %v552_v14 }
 0x15b   :  { %v504_v13 = vand.u32 2147483647, %v472_v9  ;;  %v617_v19 = vadd.f32 1.0, %v861_v16 }
 0x15c   :  { %v863_v18 = vpop.eup %862 }
 0x15d   :  { %v520_v17 = vsub.f32 0.0, %v504_v13  ;;  %868 = vlog2.f32 %v617_v19 }
 0x15e   :  { %870 = vpow2.f32 %v548_v20 }
 0x15f   :  { %v865_v21 = vpop.eup %864  ;;  %v550_v43 = vmul.f32 1.442695, %v520_v17 }
 0x160   :  { %v626_v22 = vadd.f32 1.0, %v865_v21  ;;  %v867_v23 = vpop.eup %866 }
 0x161   :  { %v689_v24 = vadd.f32 1.0, %v867_v23 }
 0x162   :  { %872 = vlog2.f32 %v626_v22 }
 0x163   :  { %874 = vpow2.f32 %v550_v43  ;;  %v869_v36 = vpop.eup %868 }
 0x164   :  { %v871_v25 = vpop.eup %870  ;;  %876 = vlog2.f32 %v689_v24 }
 0x165   :  { %v671_v27 = vadd.f32 1.0, %v871_v25 }
 0x167   :  { %878 = vlog2.f32 %v671_v27 }
 0x168   :  { %v873_v26 = vpop.eup %872 }
 0x169   :  { %v875_v40 = vpop.eup %874 }
 0x16a   :  { %v680_v28 = vadd.f32 1.0, %v875_v40  ;;  %v877_v29 = vpop.eup %876 }
 0x16c   :  { %880 = vlog2.f32 %v680_v28 }
 0x16d   :  { %v879_v30 = vpop.eup %878 }
 0x172   :  { %v881_v31 = vpop.eup %880 }
 0x173   :  { %768 = vsyncpa [#allocation4], 1 }
 0x174   :  { %769 = vsyncpa [#allocation6], 1 }
 0x175   :  { %770 = vsyncpa [#allocation9], 1 }

</bundles_post_ra>
